<compile_context>
chip_gen: v7x
topology: tpu7x:2x2x1
jax: 0.10.0
libtpu: 0.0.40
codegen_flags: <defaults>
</compile_context>

<pallas_src>
import functools

import jax
import jax.numpy as jnp
from jax import lax
from jax.experimental import pallas as pl
from jax.experimental.pallas import tpu as pltpu


def _lstm_chunk_kernel(TC, Btile, T, H,
                       ids_ref,                                    # scalar prefetch (SMEM)
                       table_ref, wih_ref, whh_ref, b_ref,         # inputs (VMEM resident)
                       wfc_ref, bfc_ref,
                       out_ref,                                    # output
                       emb_ref, gx_ref, h_ref, c_ref):             # scratch
    """Grid = (batch_tile, chunk).  One call == TC timesteps of one batch tile.

    ids_ref:   (n_bt*T*Btile,) int32 SMEM, [bt, t, row-in-tile] flattened
    table_ref: (V, E)          f32   VMEM-resident embedding table
    wih_ref:   (E, 4H)  bf16 | whh_ref: (H, 4H) bf16 | b_ref: (1, 4H) f32
    wfc_ref:   (H, Cp)  bf16 | bfc_ref: (1, Cp) f32
    out_ref:   (Btile, Cp) f32  written on the last chunk only
    emb_ref:   (Btile, E)       f32  one timestep's gathered embedding slab
    gx_ref:    (TC, Btile, 4H)  bf16 chunk input projection x_t @ W_ih
    h_ref/c_ref: (Btile, H)     f32  recurrent state, persists across chunks
    """
    bt = pl.program_id(0)
    k = pl.program_id(1)
    nc = pl.num_programs(1)
    base = (bt * T + k * TC) * Btile           # flat ids offset of this (bt, chunk)

    @pl.when(k == 0)
    def _():
        h_ref[...] = jnp.zeros_like(h_ref)
        c_ref[...] = jnp.zeros_like(c_ref)

    # ---- chunk input projection -------------------------------------------
    # Per timestep: gather the (Btile, E) embedding slab from the VMEM-resident
    # table (dynamic row loads, static row stores — no HBM DMAs, no waits),
    # then gx[t] = x_t @ W_ih with f32 MXU accumulation, stored bf16.
    @pl.loop(0, TC)
    def _(t):
        for rb in range(Btile):                              # static store offsets
            tok = ids_ref[base + t * Btile + rb]
            emb_ref[pl.ds(rb, 1), :] = table_ref[pl.ds(tok, 1), :]
        gx_ref[t] = jnp.dot(emb_ref[...].astype(jnp.bfloat16), wih_ref[...],
                            preferred_element_type=jnp.float32).astype(jnp.bfloat16)

    bias = jnp.broadcast_to(b_ref[...], (Btile, 4 * H))      # hoisted out of the loop

    def sigmoid(x):                                          # 1 EUP tanh, no exp+recip
        return 0.5 * jnp.tanh(0.5 * x) + 0.5

    def step(t, carry):
        h, c = carry
        gates = (jnp.dot(h.astype(jnp.bfloat16), whh_ref[...],
                         preferred_element_type=jnp.float32)
                 + gx_ref[t].astype(jnp.float32) + bias)     # (Btile, 4H) f32
        i_g = sigmoid(gates[:, 0 * H:1 * H])
        f_g = sigmoid(gates[:, 1 * H:2 * H])
        g_g = jnp.tanh(gates[:, 2 * H:3 * H])
        o_g = sigmoid(gates[:, 3 * H:4 * H])
        c_new = f_g * c + i_g * g_g
        h_new = o_g * jnp.tanh(c_new)
        return h_new, c_new

    # Modest unroll: full unroll of long chunks blows code size and vreg
    # live ranges (gates alone is ~64 vregs at Btile=128).
    h, c = lax.fori_loop(0, TC, step, (h_ref[...], c_ref[...]), unroll=4)
    h_ref[...] = h
    c_ref[...] = c

    @pl.when(k == nc - 1)
    def _():
        out_ref[...] = jnp.dot(h.astype(jnp.bfloat16), wfc_ref[...],
                               preferred_element_type=jnp.float32) + bfc_ref[...]


def _vmem_capacity_bytes():
    """Per-generation VMEM capacity; conservative fallback if the query fails."""
    try:
        info = pltpu.get_tpu_info()
        for attr in ("vmem_capacity_bytes", "vmem_size_bytes", "vmem_bytes"):
            cap = getattr(info, attr, None)
            if cap:
                return int(cap)
    except Exception:
        pass
    return 64 << 20          # v7x physical VMEM (smallest generation)


def lstm_classifier_forward(ids, params, *, chunk_len=None, batch_pad=8):
    """ids: (B, T) int32 token indices. Returns (B, C) float32 logits."""
    B, T = ids.shape
    table, w_ih_t, w_hh_t, b, w_fc_t, b_fc = params
    V, E = table.shape
    H = w_hh_t.shape[0]
    C = w_fc_t.shape[1]

    # ---- batch padding / tiling --------------------------------------------
    # Pad to a sublane multiple.  On real workloads pass >=128 sequences per
    # call (or batch_pad=128/256): per-step matmul cost is ~flat up to the MXU
    # row count.  Batches > 256 are split into 128-row tiles on a leading
    # "parallel" grid axis so v7x's two TensorCores each take half.
    Bp = max(8, int(batch_pad), -(-B // 8) * 8)
    Bp = -(-Bp // 8) * 8
    if Bp > 256:
        Btile = 128
        Bp = -(-Bp // Btile) * Btile
    else:
        Btile = Bp
    n_bt = Bp // Btile

    Cp = -(-C // 128) * 128                      # lane-dense classifier output

    # ---- VMEM budgeting (per generation, includes the batch tile) -----------
    vmem_cap = _vmem_capacity_bytes()
    fixed = (2 * V * E * 4                                        # f32 table (2 bufs)
             + 2 * (E * 4 * H * 2 + H * 4 * H * 2 + 4 * H * 4)    # w_ih, w_hh, bias
             + 2 * (H * Cp * 2 + Cp * 4)                          # w_fc, b_fc
             + 2 * Btile * Cp * 4                                 # out (2 bufs)
             + Btile * E * 4                                      # emb slab
             + 2 * Btile * H * 4)                                 # h, c
    per_step = Btile * 4 * H * 2                                  # gx (bf16) per timestep
    budget = int(vmem_cap * 0.6)
    if fixed + per_step > budget:
        raise ValueError(
            "Embedding table / weights exceed the VMEM budget for this TPU; "
            "an HBM-resident table with DMA gather would be needed at this size.")
    if chunk_len is None:
        chunk_len = max(d for d in range(1, T + 1)
                        if T % d == 0 and d <= 512
                        and fixed + d * per_step <= budget)
    assert T % chunk_len == 0, "chunk_len must divide T"
    TC = chunk_len
    n_chunks = T // TC
    vmem_limit = int(min(vmem_cap * 0.9, fixed + TC * per_step + (16 << 20)))

    # ---- operand preparation -------------------------------------------------
    # ids flattened as [batch-tile, time, row-in-tile] for SMEM scalar reads.
    # (For very long T*Bp this could instead be staged per chunk; fine here.)
    ids_p = jnp.zeros((Bp, T), jnp.int32).at[:B].set(ids.astype(jnp.int32))
    ids_flat = ids_p.reshape(n_bt, Btile, T).transpose(0, 2, 1).reshape(-1)

    table_f32 = table.astype(jnp.float32)        # f32 rows -> native-tiled dynamic gather
    wih_bf = w_ih_t.astype(jnp.bfloat16)
    whh_bf = w_hh_t.astype(jnp.bfloat16)
    wfc_bf = jnp.zeros((H, Cp), jnp.bfloat16).at[:, :C].set(w_fc_t.astype(jnp.bfloat16))
    b_f32 = b.astype(jnp.float32).reshape(1, 4 * H)
    bfc_p = jnp.zeros((1, Cp), jnp.float32).at[:, :C].set(
        b_fc.astype(jnp.float32).reshape(1, C))

    kernel = functools.partial(_lstm_chunk_kernel, TC, Btile, T, H)

    out = pl.pallas_call(
        kernel,
        out_shape=jax.ShapeDtypeStruct((Bp, Cp), jnp.float32),
        grid_spec=pltpu.PrefetchScalarGridSpec(
            num_scalar_prefetch=1,
            grid=(n_bt, n_chunks),
            in_specs=[
                pl.BlockSpec((V, E),      lambda bt, k, ids: (0, 0)),   # table (VMEM resident)
                pl.BlockSpec((E, 4 * H),  lambda bt, k, ids: (0, 0)),   # w_ih
                pl.BlockSpec((H, 4 * H),  lambda bt, k, ids: (0, 0)),   # w_hh
                pl.BlockSpec((1, 4 * H),  lambda bt, k, ids: (0, 0)),   # bias
                pl.BlockSpec((H, Cp),     lambda bt, k, ids: (0, 0)),   # w_fc
                pl.BlockSpec((1, Cp),     lambda bt, k, ids: (0, 0)),   # b_fc
            ],
            out_specs=pl.BlockSpec((Btile, Cp), lambda bt, k, ids: (bt, 0)),
            scratch_shapes=[
                pltpu.VMEM((Btile, E), jnp.float32),             # emb slab
                pltpu.VMEM((TC, Btile, 4 * H), jnp.bfloat16),    # gx chunk (bf16)
                pltpu.VMEM((Btile, H), jnp.float32),             # h
                pltpu.VMEM((Btile, H), jnp.float32),             # c
            ],
        ),
        compiler_params=pltpu.CompilerParams(
            dimension_semantics=("parallel", "arbitrary"),       # batch tiles || , chunks seq
            vmem_limit_bytes=vmem_limit,
        ),
    )(ids_flat, table_f32, wih_bf, whh_bf, b_f32, wfc_bf, bfc_p)
    return out[:B, :C]


def _reference_forward(ids, params):
    """Pure-JAX f32 reference mirroring torch nn.LSTM semantics."""
    table, w_ih_t, w_hh_t, b, w_fc_t, b_fc = [jnp.asarray(p, jnp.float32) for p in params]
    H = w_hh_t.shape[0]
    emb = table[ids]                                              # (B, T, E)
    B, T, _ = emb.shape
    h = jnp.zeros((B, H), jnp.float32)
    c = jnp.zeros((B, H), jnp.float32)
    for t in range(T):
        gates = emb[:, t, :] @ w_ih_t + h @ w_hh_t + b
        i_g = jax.nn.sigmoid(gates[:, 0 * H:1 * H])
        f_g = jax.nn.sigmoid(gates[:, 1 * H:2 * H])
        g_g = jnp.tanh(gates[:, 2 * H:3 * H])
        o_g = jax.nn.sigmoid(gates[:, 3 * H:4 * H])
        c = f_g * c + i_g * g_g
        h = o_g * jnp.tanh(c)
    return h @ w_fc_t + b_fc


def make_params(key, vocab_size, embed_dim, hidden_dim, output_dim, pad_idx=0):
    ks = jax.random.split(key, 7)
    scale = 1.0 / jnp.sqrt(hidden_dim)
    table = jax.random.normal(ks[0], (vocab_size, embed_dim), jnp.float32)
    table = table.at[pad_idx].set(0.0)            # padding_idx row is zero
    w_ih = jax.random.uniform(ks[1], (4 * hidden_dim, embed_dim),
                              jnp.float32, -scale, scale)
    w_hh = jax.random.uniform(ks[2], (4 * hidden_dim, hidden_dim),
                              jnp.float32, -scale, scale)
    b_ih = jax.random.uniform(ks[3], (4 * hidden_dim,), jnp.float32, -scale, scale)
    b_hh = jax.random.uniform(ks[4], (4 * hidden_dim,), jnp.float32, -scale, scale)
    w_fc = jax.random.uniform(ks[5], (output_dim, hidden_dim),
                              jnp.float32, -scale, scale)
    b_fc = jax.random.uniform(ks[6], (output_dim,), jnp.float32, -scale, scale)
    return (table,
            w_ih.T,                              # (E, 4H)
            w_hh.T,                              # (H, 4H)
            (b_ih + b_hh).reshape(1, -1),        # (1, 4H)  combined bias
            w_fc.T,                              # (H, C)
            b_fc.reshape(1, -1))                 # (1, C)


if __name__ == "__main__":
    VOCAB, EMBED, HIDDEN, OUT = 512, 128, 128, 2
    B, T = 2, 8

    key = jax.random.PRNGKey(0)
    k_ids, k_par = jax.random.split(key)
    ids = jax.random.randint(k_ids, (B, T), 0, VOCAB, dtype=jnp.int32)
    params = make_params(k_par, VOCAB, EMBED, HIDDEN, OUT)

    # chunk_len=4 -> 2 chunks, exercising cross-chunk h/c state carry.
    logits = lstm_classifier_forward(ids, params, chunk_len=4)
    jax.block_until_ready(logits)

    # Reference uses the same bf16-quantized matmul operands the kernel consumes
    # (upcast to f32); remaining kernel error is gx/h bf16 rounding per step.
    table, w_ih_t, w_hh_t, b, w_fc_t, b_fc = params
    q = lambda w: w.astype(jnp.bfloat16).astype(jnp.float32)
    ref = _reference_forward(ids, (q(table), q(w_ih_t), q(w_hh_t), b, q(w_fc_t), b_fc))

    assert logits.shape == (B, OUT)
    assert jnp.allclose(logits, ref, atol=3e-2, rtol=3e-2), (logits, ref)

    print("KERNEL_OK")
</pallas_src>

<mosaic_0001>
module attributes {stable_mosaic.version = 11 : i64} {
  func.func @_lstm_chunk_kernel(%arg0: i32, %arg1: i32, %arg2: memref<64xi32, #tpu.memory_space<smem>>, %arg3: memref<512x128xf32, #tpu.memory_space<vmem>>, %arg4: memref<128x512xbf16, #tpu.memory_space<vmem>>, %arg5: memref<128x512xbf16, #tpu.memory_space<vmem>>, %arg6: memref<1x512xf32, #tpu.memory_space<vmem>>, %arg7: memref<128x128xbf16, #tpu.memory_space<vmem>>, %arg8: memref<1x128xf32, #tpu.memory_space<vmem>>, %arg9: memref<8x128xf32, #tpu.memory_space<vmem>>, %arg10: memref<8x128xf32, #tpu.memory_space<vmem>>, %arg11: memref<4x8x512xbf16, #tpu.memory_space<vmem>>, %arg12: memref<8x128xf32, #tpu.memory_space<vmem>>, %arg13: memref<8x128xf32, #tpu.memory_space<vmem>>) attributes {dimension_semantics = [#tpu.dimension_semantics<parallel>, #tpu.dimension_semantics<arbitrary>], iteration_bounds = array<i64: 1, 2>, scalar_prefetch = 1 : i64, scratch_operands = 4 : i64, tpu.core_type = #tpu.core_type<tc>, window_params = [{pipeline_mode = #tpu.pipeline_mode<synchronous>, transform_indices = @transform_0, window_bounds = array<i64: 512, 128>}, {pipeline_mode = #tpu.pipeline_mode<synchronous>, transform_indices = @transform_1, window_bounds = array<i64: 128, 512>}, {pipeline_mode = #tpu.pipeline_mode<synchronous>, transform_indices = @transform_2, window_bounds = array<i64: 128, 512>}, {pipeline_mode = #tpu.pipeline_mode<synchronous>, transform_indices = @transform_3, window_bounds = array<i64: 1, 512>}, {pipeline_mode = #tpu.pipeline_mode<synchronous>, transform_indices = @transform_4, window_bounds = array<i64: 128, 128>}, {pipeline_mode = #tpu.pipeline_mode<synchronous>, transform_indices = @transform_5, window_bounds = array<i64: 1, 128>}, {transform_indices = @transform_6, window_bounds = array<i64: 8, 128>}]} {
    %c8_i32 = arith.constant 8 : i32
    %0 = arith.muli %arg0, %c8_i32 : i32
    %c4_i32 = arith.constant 4 : i32
    %1 = arith.muli %arg1, %c4_i32 : i32
    %2 = arith.addi %0, %1 : i32
    %c8_i32_0 = arith.constant 8 : i32
    %3 = arith.muli %2, %c8_i32_0 : i32
    %c0_i32 = arith.constant 0 : i32
    %4 = arith.cmpi eq, %arg1, %c0_i32 : i32
    %5 = arith.extui %4 : i1 to i32
    %c0_i32_1 = arith.constant 0 : i32
    %6 = arith.cmpi ne, %5, %c0_i32_1 : i32
    scf.if %6 {
      %cst_74 = arith.constant 0.000000e+00 : f32
      %178 = vector.broadcast %cst_74 : f32 to vector<8x128xf32>
      %c0_75 = arith.constant 0 : index
      %c0_76 = arith.constant 0 : index
      %179 = vector.load %arg12[%c0_75, %c0_76] : memref<8x128xf32, #tpu.memory_space<vmem>>, vector<8x128xf32>
      tpu.vector_store %arg12[%c0_75, %c0_76], %178 {strides = array<i32>} : memref<8x128xf32, #tpu.memory_space<vmem>>, vector<8x128xf32>,
      %cst_77 = arith.constant 0.000000e+00 : f32
      %180 = vector.broadcast %cst_77 : f32 to vector<8x128xf32>
      %c0_78 = arith.constant 0 : index
      %c0_79 = arith.constant 0 : index
      %181 = vector.load %arg13[%c0_78, %c0_79] : memref<8x128xf32, #tpu.memory_space<vmem>>, vector<8x128xf32>
      tpu.vector_store %arg13[%c0_78, %c0_79], %180 {strides = array<i32>} : memref<8x128xf32, #tpu.memory_space<vmem>>, vector<8x128xf32>,
    } else {
    }
    %c0_i32_2 = arith.constant 0 : i32
    %c4_i32_3 = arith.constant 4 : i32
    %7 = arith.addi %c0_i32_2, %c4_i32_3 : i32
    %c1_i32 = arith.constant 1 : i32
    scf.for %arg14 = %c0_i32_2 to %7 step %c1_i32  : i32 {
      %c1_i32_74 = arith.constant 1 : i32
      %178 = arith.muli %arg14, %c1_i32_74 : i32
      %c0_i32_75 = arith.constant 0 : i32
      %179 = arith.addi %c0_i32_75, %178 : i32
      %c8_i32_76 = arith.constant 8 : i32
      %180 = arith.muli %179, %c8_i32_76 : i32
      %181 = arith.addi %3, %180 : i32
      %c0_i32_77 = arith.constant 0 : i32
      %182 = arith.addi %181, %c0_i32_77 : i32
      %183 = arith.index_cast %182 : i32 to index
      %184 = memref.load %arg2[%183] : memref<64xi32, #tpu.memory_space<smem>>
      %185 = arith.index_cast %184 : i32 to index
      %c0_78 = arith.constant 0 : index
      %186 = vector.load %arg3[%185, %c0_78] : memref<512x128xf32, #tpu.memory_space<vmem>>, vector<1x128xf32>
      %c0_79 = arith.constant 0 : index
      %c0_80 = arith.constant 0 : index
      %187 = vector.load %arg10[%c0_79, %c0_80] : memref<8x128xf32, #tpu.memory_space<vmem>>, vector<1x128xf32>
      tpu.vector_store %arg10[%c0_79, %c0_80], %186 {strides = array<i32>} : memref<8x128xf32, #tpu.memory_space<vmem>>, vector<1x128xf32>,
      %c8_i32_81 = arith.constant 8 : i32
      %188 = arith.muli %179, %c8_i32_81 : i32
      %189 = arith.addi %3, %188 : i32
      %c1_i32_82 = arith.constant 1 : i32
      %190 = arith.addi %189, %c1_i32_82 : i32
      %191 = arith.index_cast %190 : i32 to index
      %192 = memref.load %arg2[%191] : memref<64xi32, #tpu.memory_space<smem>>
      %193 = arith.index_cast %192 : i32 to index
      %c0_83 = arith.constant 0 : index
      %194 = vector.load %arg3[%193, %c0_83] : memref<512x128xf32, #tpu.memory_space<vmem>>, vector<1x128xf32>
      %c1 = arith.constant 1 : index
      %c0_84 = arith.constant 0 : index
      %195 = vector.load %arg10[%c1, %c0_84] : memref<8x128xf32, #tpu.memory_space<vmem>>, vector<1x128xf32>
      tpu.vector_store %arg10[%c1, %c0_84], %194 {strides = array<i32>} : memref<8x128xf32, #tpu.memory_space<vmem>>, vector<1x128xf32>,
      %c8_i32_85 = arith.constant 8 : i32
      %196 = arith.muli %179, %c8_i32_85 : i32
      %197 = arith.addi %3, %196 : i32
      %c2_i32_86 = arith.constant 2 : i32
      %198 = arith.addi %197, %c2_i32_86 : i32
      %199 = arith.index_cast %198 : i32 to index
      %200 = memref.load %arg2[%199] : memref<64xi32, #tpu.memory_space<smem>>
      %201 = arith.index_cast %200 : i32 to index
      %c0_87 = arith.constant 0 : index
      %202 = vector.load %arg3[%201, %c0_87] : memref<512x128xf32, #tpu.memory_space<vmem>>, vector<1x128xf32>
      %c2 = arith.constant 2 : index
      %c0_88 = arith.constant 0 : index
      %203 = vector.load %arg10[%c2, %c0_88] : memref<8x128xf32, #tpu.memory_space<vmem>>, vector<1x128xf32>
      tpu.vector_store %arg10[%c2, %c0_88], %202 {strides = array<i32>} : memref<8x128xf32, #tpu.memory_space<vmem>>, vector<1x128xf32>,
      %c8_i32_89 = arith.constant 8 : i32
      %204 = arith.muli %179, %c8_i32_89 : i32
      %205 = arith.addi %3, %204 : i32
      %c3_i32_90 = arith.constant 3 : i32
      %206 = arith.addi %205, %c3_i32_90 : i32
      %207 = arith.index_cast %206 : i32 to index
      %208 = memref.load %arg2[%207] : memref<64xi32, #tpu.memory_space<smem>>
      %209 = arith.index_cast %208 : i32 to index
      %c0_91 = arith.constant 0 : index
      %210 = vector.load %arg3[%209, %c0_91] : memref<512x128xf32, #tpu.memory_space<vmem>>, vector<1x128xf32>
      %c3 = arith.constant 3 : index
      %c0_92 = arith.constant 0 : index
      %211 = vector.load %arg10[%c3, %c0_92] : memref<8x128xf32, #tpu.memory_space<vmem>>, vector<1x128xf32>
      tpu.vector_store %arg10[%c3, %c0_92], %210 {strides = array<i32>} : memref<8x128xf32, #tpu.memory_space<vmem>>, vector<1x128xf32>,
      %c8_i32_93 = arith.constant 8 : i32
      %212 = arith.muli %179, %c8_i32_93 : i32
      %213 = arith.addi %3, %212 : i32
      %c4_i32_94 = arith.constant 4 : i32
      %214 = arith.addi %213, %c4_i32_94 : i32
      %215 = arith.index_cast %214 : i32 to index
      %216 = memref.load %arg2[%215] : memref<64xi32, #tpu.memory_space<smem>>
      %217 = arith.index_cast %216 : i32 to index
      %c0_95 = arith.constant 0 : index
      %218 = vector.load %arg3[%217, %c0_95] : memref<512x128xf32, #tpu.memory_space<vmem>>, vector<1x128xf32>
      %c4 = arith.constant 4 : index
      %c0_96 = arith.constant 0 : index
      %219 = vector.load %arg10[%c4, %c0_96] : memref<8x128xf32, #tpu.memory_space<vmem>>, vector<1x128xf32>
      tpu.vector_store %arg10[%c4, %c0_96], %218 {strides = array<i32>} : memref<8x128xf32, #tpu.memory_space<vmem>>, vector<1x128xf32>,
      %c8_i32_97 = arith.constant 8 : i32
      %220 = arith.muli %179, %c8_i32_97 : i32
      %221 = arith.addi %3, %220 : i32
      %c5_i32 = arith.constant 5 : i32
      %222 = arith.addi %221, %c5_i32 : i32
      %223 = arith.index_cast %222 : i32 to index
      %224 = memref.load %arg2[%223] : memref<64xi32, #tpu.memory_space<smem>>
      %225 = arith.index_cast %224 : i32 to index
      %c0_98 = arith.constant 0 : index
      %226 = vector.load %arg3[%225, %c0_98] : memref<512x128xf32, #tpu.memory_space<vmem>>, vector<1x128xf32>
      %c5 = arith.constant 5 : index
      %c0_99 = arith.constant 0 : index
      %227 = vector.load %arg10[%c5, %c0_99] : memref<8x128xf32, #tpu.memory_space<vmem>>, vector<1x128xf32>
      tpu.vector_store %arg10[%c5, %c0_99], %226 {strides = array<i32>} : memref<8x128xf32, #tpu.memory_space<vmem>>, vector<1x128xf32>,
      %c8_i32_100 = arith.constant 8 : i32
      %228 = arith.muli %179, %c8_i32_100 : i32
      %229 = arith.addi %3, %228 : i32
      %c6_i32 = arith.constant 6 : i32
      %230 = arith.addi %229, %c6_i32 : i32
      %231 = arith.index_cast %230 : i32 to index
      %232 = memref.load %arg2[%231] : memref<64xi32, #tpu.memory_space<smem>>
      %233 = arith.index_cast %232 : i32 to index
      %c0_101 = arith.constant 0 : index
      %234 = vector.load %arg3[%233, %c0_101] : memref<512x128xf32, #tpu.memory_space<vmem>>, vector<1x128xf32>
      %c6 = arith.constant 6 : index
      %c0_102 = arith.constant 0 : index
      %235 = vector.load %arg10[%c6, %c0_102] : memref<8x128xf32, #tpu.memory_space<vmem>>, vector<1x128xf32>
      tpu.vector_store %arg10[%c6, %c0_102], %234 {strides = array<i32>} : memref<8x128xf32, #tpu.memory_space<vmem>>, vector<1x128xf32>,
      %c8_i32_103 = arith.constant 8 : i32
      %236 = arith.muli %179, %c8_i32_103 : i32
      %237 = arith.addi %3, %236 : i32
      %c7_i32 = arith.constant 7 : i32
      %238 = arith.addi %237, %c7_i32 : i32
      %239 = arith.index_cast %238 : i32 to index
      %240 = memref.load %arg2[%239] : memref<64xi32, #tpu.memory_space<smem>>
      %241 = arith.index_cast %240 : i32 to index
      %c0_104 = arith.constant 0 : index
      %242 = vector.load %arg3[%241, %c0_104] : memref<512x128xf32, #tpu.memory_space<vmem>>, vector<1x128xf32>
      %c7 = arith.constant 7 : index
      %c0_105 = arith.constant 0 : index
      %243 = vector.load %arg10[%c7, %c0_105] : memref<8x128xf32, #tpu.memory_space<vmem>>, vector<1x128xf32>
      tpu.vector_store %arg10[%c7, %c0_105], %242 {strides = array<i32>} : memref<8x128xf32, #tpu.memory_space<vmem>>, vector<1x128xf32>,
      %c0_106 = arith.constant 0 : index
      %c0_107 = arith.constant 0 : index
      %244 = vector.load %arg10[%c0_106, %c0_107] : memref<8x128xf32, #tpu.memory_space<vmem>>, vector<8x128xf32>
      %245 = arith.truncf %244 : vector<8x128xf32> to vector<8x128xbf16>
      %c0_108 = arith.constant 0 : index
      %c0_109 = arith.constant 0 : index
      %246 = vector.load %arg4[%c0_108, %c0_109] : memref<128x512xbf16, #tpu.memory_space<vmem>>, vector<128x512xbf16>
      %cst_110 = arith.constant dense<0.000000e+00> : vector<8x512xf32>
      %247 = tpu.matmul %245, %246, %cst_110 {dimension_numbers = #tpu.dot_dimension_numbers<[1], [0], [0], [1], [0, 0, 1, 1], [], []>} : vector<8x128xbf16>, vector<128x512xbf16>, vector<8x512xf32> -> vector<8x512xf32>
      %248 = arith.truncf %247 : vector<8x512xf32> to vector<8x512xbf16>
      %249 = arith.index_cast %179 : i32 to index
      %c0_111 = arith.constant 0 : index
      %c0_112 = arith.constant 0 : index
      %250 = vector.load %arg11[%249, %c0_111, %c0_112] : memref<4x8x512xbf16, #tpu.memory_space<vmem>>, vector<1x8x512xbf16>
      %251 = vector.shape_cast %250 : vector<1x8x512xbf16> to vector<8x512xbf16>
      %252 = vector.shape_cast %248 : vector<8x512xbf16> to vector<1x8x512xbf16>
      tpu.vector_store %arg11[%249, %c0_111, %c0_112], %252 {strides = array<i32>} : memref<4x8x512xbf16, #tpu.memory_space<vmem>>, vector<1x8x512xbf16>,
    }
    %c4_i32_4 = arith.constant 4 : i32
    %c0 = arith.constant 0 : index
    %c0_5 = arith.constant 0 : index
    %8 = vector.load %arg6[%c0, %c0_5] : memref<1x512xf32, #tpu.memory_space<vmem>>, vector<1x512xf32>
    %9 = vector.shape_cast %8 : vector<1x512xf32> to vector<1x512xf32>
    %10 = vector.broadcast %9 : vector<1x512xf32> to vector<8x512xf32>
    %c0_6 = arith.constant 0 : index
    %c0_7 = arith.constant 0 : index
    %11 = vector.load %arg12[%c0_6, %c0_7] : memref<8x128xf32, #tpu.memory_space<vmem>>, vector<8x128xf32>
    %c0_8 = arith.constant 0 : index
    %c0_9 = arith.constant 0 : index
    %12 = vector.load %arg13[%c0_8, %c0_9] : memref<8x128xf32, #tpu.memory_space<vmem>>, vector<8x128xf32>
    %c0_i32_10 = arith.constant 0 : i32
    %13 = arith.truncf %11 : vector<8x128xf32> to vector<8x128xbf16>
    %c0_11 = arith.constant 0 : index
    %c0_12 = arith.constant 0 : index
    %14 = vector.load %arg5[%c0_11, %c0_12] : memref<128x512xbf16, #tpu.memory_space<vmem>>, vector<128x512xbf16>
    %cst = arith.constant dense<0.000000e+00> : vector<8x512xf32>
    %15 = tpu.matmul %13, %14, %cst {dimension_numbers = #tpu.dot_dimension_numbers<[1], [0], [0], [1], [0, 0, 1, 1], [], []>} : vector<8x128xbf16>, vector<128x512xbf16>, vector<8x512xf32> -> vector<8x512xf32>
    %16 = arith.index_cast %c0_i32_10 : i32 to index
    %c0_13 = arith.constant 0 : index
    %c0_14 = arith.constant 0 : index
    %17 = vector.load %arg11[%16, %c0_13, %c0_14] : memref<4x8x512xbf16, #tpu.memory_space<vmem>>, vector<1x8x512xbf16>
    %18 = vector.shape_cast %17 : vector<1x8x512xbf16> to vector<8x512xbf16>
    %19 = arith.extf %18 : vector<8x512xbf16> to vector<8x512xf32>
    %20 = arith.addf %15, %19 : vector<8x512xf32>
    %21 = arith.addf %20, %10 : vector<8x512xf32>
    %22 = vector.extract_strided_slice %21 {offsets = [0, 0], sizes = [8, 128], strides = [1, 1]} : vector<8x512xf32> to vector<8x128xf32>
    %cst_15 = arith.constant 5.000000e-01 : f32
    %23 = vector.broadcast %cst_15 : f32 to vector<8x128xf32>
    %24 = arith.mulf %23, %22 : vector<8x128xf32>
    %25 = math.tanh %24 : vector<8x128xf32>
    %cst_16 = arith.constant 5.000000e-01 : f32
    %26 = vector.broadcast %cst_16 : f32 to vector<8x128xf32>
    %27 = arith.mulf %26, %25 : vector<8x128xf32>
    %cst_17 = arith.constant 5.000000e-01 : f32
    %28 = vector.broadcast %cst_17 : f32 to vector<8x128xf32>
    %29 = arith.addf %27, %28 : vector<8x128xf32>
    %30 = vector.extract_strided_slice %21 {offsets = [0, 128], sizes = [8, 128], strides = [1, 1]} : vector<8x512xf32> to vector<8x128xf32>
    %cst_18 = arith.constant 5.000000e-01 : f32
    %31 = vector.broadcast %cst_18 : f32 to vector<8x128xf32>
    %32 = arith.mulf %31, %30 : vector<8x128xf32>
    %33 = math.tanh %32 : vector<8x128xf32>
    %cst_19 = arith.constant 5.000000e-01 : f32
    %34 = vector.broadcast %cst_19 : f32 to vector<8x128xf32>
    %35 = arith.mulf %34, %33 : vector<8x128xf32>
    %cst_20 = arith.constant 5.000000e-01 : f32
    %36 = vector.broadcast %cst_20 : f32 to vector<8x128xf32>
    %37 = arith.addf %35, %36 : vector<8x128xf32>
    %38 = vector.extract_strided_slice %21 {offsets = [0, 256], sizes = [8, 128], strides = [1, 1]} : vector<8x512xf32> to vector<8x128xf32>
    %39 = math.tanh %38 : vector<8x128xf32>
    %40 = vector.extract_strided_slice %21 {offsets = [0, 384], sizes = [8, 128], strides = [1, 1]} : vector<8x512xf32> to vector<8x128xf32>
    %cst_21 = arith.constant 5.000000e-01 : f32
    %41 = vector.broadcast %cst_21 : f32 to vector<8x128xf32>
    %42 = arith.mulf %41, %40 : vector<8x128xf32>
    %43 = math.tanh %42 : vector<8x128xf32>
    %cst_22 = arith.constant 5.000000e-01 : f32
    %44 = vector.broadcast %cst_22 : f32 to vector<8x128xf32>
    %45 = arith.mulf %44, %43 : vector<8x128xf32>
    %cst_23 = arith.constant 5.000000e-01 : f32
    %46 = vector.broadcast %cst_23 : f32 to vector<8x128xf32>
    %47 = arith.addf %45, %46 : vector<8x128xf32>
    %48 = arith.mulf %37, %12 : vector<8x128xf32>
    %49 = arith.mulf %29, %39 : vector<8x128xf32>
    %50 = arith.addf %48, %49 : vector<8x128xf32>
    %51 = math.tanh %50 : vector<8x128xf32>
    %52 = arith.mulf %47, %51 : vector<8x128xf32>
    %c1_i32_24 = arith.constant 1 : i32
    %53 = arith.truncf %52 : vector<8x128xf32> to vector<8x128xbf16>
    %c0_25 = arith.constant 0 : index
    %c0_26 = arith.constant 0 : index
    %54 = vector.load %arg5[%c0_25, %c0_26] : memref<128x512xbf16, #tpu.memory_space<vmem>>, vector<128x512xbf16>
    %cst_27 = arith.constant dense<0.000000e+00> : vector<8x512xf32>
    %55 = tpu.matmul %53, %54, %cst_27 {dimension_numbers = #tpu.dot_dimension_numbers<[1], [0], [0], [1], [0, 0, 1, 1], [], []>} : vector<8x128xbf16>, vector<128x512xbf16>, vector<8x512xf32> -> vector<8x512xf32>
    %56 = arith.index_cast %c1_i32_24 : i32 to index
    %c0_28 = arith.constant 0 : index
    %c0_29 = arith.constant 0 : index
    %57 = vector.load %arg11[%56, %c0_28, %c0_29] : memref<4x8x512xbf16, #tpu.memory_space<vmem>>, vector<1x8x512xbf16>
    %58 = vector.shape_cast %57 : vector<1x8x512xbf16> to vector<8x512xbf16>
    %59 = arith.extf %58 : vector<8x512xbf16> to vector<8x512xf32>
    %60 = arith.addf %55, %59 : vector<8x512xf32>
    %61 = arith.addf %60, %10 : vector<8x512xf32>
    %62 = vector.extract_strided_slice %61 {offsets = [0, 0], sizes = [8, 128], strides = [1, 1]} : vector<8x512xf32> to vector<8x128xf32>
    %cst_30 = arith.constant 5.000000e-01 : f32
    %63 = vector.broadcast %cst_30 : f32 to vector<8x128xf32>
    %64 = arith.mulf %63, %62 : vector<8x128xf32>
    %65 = math.tanh %64 : vector<8x128xf32>
    %cst_31 = arith.constant 5.000000e-01 : f32
    %66 = vector.broadcast %cst_31 : f32 to vector<8x128xf32>
    %67 = arith.mulf %66, %65 : vector<8x128xf32>
    %cst_32 = arith.constant 5.000000e-01 : f32
    %68 = vector.broadcast %cst_32 : f32 to vector<8x128xf32>
    %69 = arith.addf %67, %68 : vector<8x128xf32>
    %70 = vector.extract_strided_slice %61 {offsets = [0, 128], sizes = [8, 128], strides = [1, 1]} : vector<8x512xf32> to vector<8x128xf32>
    %cst_33 = arith.constant 5.000000e-01 : f32
    %71 = vector.broadcast %cst_33 : f32 to vector<8x128xf32>
    %72 = arith.mulf %71, %70 : vector<8x128xf32>
    %73 = math.tanh %72 : vector<8x128xf32>
    %cst_34 = arith.constant 5.000000e-01 : f32
    %74 = vector.broadcast %cst_34 : f32 to vector<8x128xf32>
    %75 = arith.mulf %74, %73 : vector<8x128xf32>
    %cst_35 = arith.constant 5.000000e-01 : f32
    %76 = vector.broadcast %cst_35 : f32 to vector<8x128xf32>
    %77 = arith.addf %75, %76 : vector<8x128xf32>
    %78 = vector.extract_strided_slice %61 {offsets = [0, 256], sizes = [8, 128], strides = [1, 1]} : vector<8x512xf32> to vector<8x128xf32>
    %79 = math.tanh %78 : vector<8x128xf32>
    %80 = vector.extract_strided_slice %61 {offsets = [0, 384], sizes = [8, 128], strides = [1, 1]} : vector<8x512xf32> to vector<8x128xf32>
    %cst_36 = arith.constant 5.000000e-01 : f32
    %81 = vector.broadcast %cst_36 : f32 to vector<8x128xf32>
    %82 = arith.mulf %81, %80 : vector<8x128xf32>
    %83 = math.tanh %82 : vector<8x128xf32>
    %cst_37 = arith.constant 5.000000e-01 : f32
    %84 = vector.broadcast %cst_37 : f32 to vector<8x128xf32>
    %85 = arith.mulf %84, %83 : vector<8x128xf32>
    %cst_38 = arith.constant 5.000000e-01 : f32
    %86 = vector.broadcast %cst_38 : f32 to vector<8x128xf32>
    %87 = arith.addf %85, %86 : vector<8x128xf32>
    %88 = arith.mulf %77, %50 : vector<8x128xf32>
    %89 = arith.mulf %69, %79 : vector<8x128xf32>
    %90 = arith.addf %88, %89 : vector<8x128xf32>
    %91 = math.tanh %90 : vector<8x128xf32>
    %92 = arith.mulf %87, %91 : vector<8x128xf32>
    %c2_i32 = arith.constant 2 : i32
    %93 = arith.truncf %92 : vector<8x128xf32> to vector<8x128xbf16>
    %c0_39 = arith.constant 0 : index
    %c0_40 = arith.constant 0 : index
    %94 = vector.load %arg5[%c0_39, %c0_40] : memref<128x512xbf16, #tpu.memory_space<vmem>>, vector<128x512xbf16>
    %cst_41 = arith.constant dense<0.000000e+00> : vector<8x512xf32>
    %95 = tpu.matmul %93, %94, %cst_41 {dimension_numbers = #tpu.dot_dimension_numbers<[1], [0], [0], [1], [0, 0, 1, 1], [], []>} : vector<8x128xbf16>, vector<128x512xbf16>, vector<8x512xf32> -> vector<8x512xf32>
    %96 = arith.index_cast %c2_i32 : i32 to index
    %c0_42 = arith.constant 0 : index
    %c0_43 = arith.constant 0 : index
    %97 = vector.load %arg11[%96, %c0_42, %c0_43] : memref<4x8x512xbf16, #tpu.memory_space<vmem>>, vector<1x8x512xbf16>
    %98 = vector.shape_cast %97 : vector<1x8x512xbf16> to vector<8x512xbf16>
    %99 = arith.extf %98 : vector<8x512xbf16> to vector<8x512xf32>
    %100 = arith.addf %95, %99 : vector<8x512xf32>
    %101 = arith.addf %100, %10 : vector<8x512xf32>
    %102 = vector.extract_strided_slice %101 {offsets = [0, 0], sizes = [8, 128], strides = [1, 1]} : vector<8x512xf32> to vector<8x128xf32>
    %cst_44 = arith.constant 5.000000e-01 : f32
    %103 = vector.broadcast %cst_44 : f32 to vector<8x128xf32>
    %104 = arith.mulf %103, %102 : vector<8x128xf32>
    %105 = math.tanh %104 : vector<8x128xf32>
    %cst_45 = arith.constant 5.000000e-01 : f32
    %106 = vector.broadcast %cst_45 : f32 to vector<8x128xf32>
    %107 = arith.mulf %106, %105 : vector<8x128xf32>
    %cst_46 = arith.constant 5.000000e-01 : f32
    %108 = vector.broadcast %cst_46 : f32 to vector<8x128xf32>
    %109 = arith.addf %107, %108 : vector<8x128xf32>
    %110 = vector.extract_strided_slice %101 {offsets = [0, 128], sizes = [8, 128], strides = [1, 1]} : vector<8x512xf32> to vector<8x128xf32>
    %cst_47 = arith.constant 5.000000e-01 : f32
    %111 = vector.broadcast %cst_47 : f32 to vector<8x128xf32>
    %112 = arith.mulf %111, %110 : vector<8x128xf32>
    %113 = math.tanh %112 : vector<8x128xf32>
    %cst_48 = arith.constant 5.000000e-01 : f32
    %114 = vector.broadcast %cst_48 : f32 to vector<8x128xf32>
    %115 = arith.mulf %114, %113 : vector<8x128xf32>
    %cst_49 = arith.constant 5.000000e-01 : f32
    %116 = vector.broadcast %cst_49 : f32 to vector<8x128xf32>
    %117 = arith.addf %115, %116 : vector<8x128xf32>
    %118 = vector.extract_strided_slice %101 {offsets = [0, 256], sizes = [8, 128], strides = [1, 1]} : vector<8x512xf32> to vector<8x128xf32>
    %119 = math.tanh %118 : vector<8x128xf32>
    %120 = vector.extract_strided_slice %101 {offsets = [0, 384], sizes = [8, 128], strides = [1, 1]} : vector<8x512xf32> to vector<8x128xf32>
    %cst_50 = arith.constant 5.000000e-01 : f32
    %121 = vector.broadcast %cst_50 : f32 to vector<8x128xf32>
    %122 = arith.mulf %121, %120 : vector<8x128xf32>
    %123 = math.tanh %122 : vector<8x128xf32>
    %cst_51 = arith.constant 5.000000e-01 : f32
    %124 = vector.broadcast %cst_51 : f32 to vector<8x128xf32>
    %125 = arith.mulf %124, %123 : vector<8x128xf32>
    %cst_52 = arith.constant 5.000000e-01 : f32
    %126 = vector.broadcast %cst_52 : f32 to vector<8x128xf32>
    %127 = arith.addf %125, %126 : vector<8x128xf32>
    %128 = arith.mulf %117, %90 : vector<8x128xf32>
    %129 = arith.mulf %109, %119 : vector<8x128xf32>
    %130 = arith.addf %128, %129 : vector<8x128xf32>
    %131 = math.tanh %130 : vector<8x128xf32>
    %132 = arith.mulf %127, %131 : vector<8x128xf32>
    %c3_i32 = arith.constant 3 : i32
    %133 = arith.truncf %132 : vector<8x128xf32> to vector<8x128xbf16>
    %c0_53 = arith.constant 0 : index
    %c0_54 = arith.constant 0 : index
    %134 = vector.load %arg5[%c0_53, %c0_54] : memref<128x512xbf16, #tpu.memory_space<vmem>>, vector<128x512xbf16>
    %cst_55 = arith.constant dense<0.000000e+00> : vector<8x512xf32>
    %135 = tpu.matmul %133, %134, %cst_55 {dimension_numbers = #tpu.dot_dimension_numbers<[1], [0], [0], [1], [0, 0, 1, 1], [], []>} : vector<8x128xbf16>, vector<128x512xbf16>, vector<8x512xf32> -> vector<8x512xf32>
    %136 = arith.index_cast %c3_i32 : i32 to index
    %c0_56 = arith.constant 0 : index
    %c0_57 = arith.constant 0 : index
    %137 = vector.load %arg11[%136, %c0_56, %c0_57] : memref<4x8x512xbf16, #tpu.memory_space<vmem>>, vector<1x8x512xbf16>
    %138 = vector.shape_cast %137 : vector<1x8x512xbf16> to vector<8x512xbf16>
    %139 = arith.extf %138 : vector<8x512xbf16> to vector<8x512xf32>
    %140 = arith.addf %135, %139 : vector<8x512xf32>
    %141 = arith.addf %140, %10 : vector<8x512xf32>
    %142 = vector.extract_strided_slice %141 {offsets = [0, 0], sizes = [8, 128], strides = [1, 1]} : vector<8x512xf32> to vector<8x128xf32>
    %cst_58 = arith.constant 5.000000e-01 : f32
    %143 = vector.broadcast %cst_58 : f32 to vector<8x128xf32>
    %144 = arith.mulf %143, %142 : vector<8x128xf32>
    %145 = math.tanh %144 : vector<8x128xf32>
    %cst_59 = arith.constant 5.000000e-01 : f32
    %146 = vector.broadcast %cst_59 : f32 to vector<8x128xf32>
    %147 = arith.mulf %146, %145 : vector<8x128xf32>
    %cst_60 = arith.constant 5.000000e-01 : f32
    %148 = vector.broadcast %cst_60 : f32 to vector<8x128xf32>
    %149 = arith.addf %147, %148 : vector<8x128xf32>
    %150 = vector.extract_strided_slice %141 {offsets = [0, 128], sizes = [8, 128], strides = [1, 1]} : vector<8x512xf32> to vector<8x128xf32>
    %cst_61 = arith.constant 5.000000e-01 : f32
    %151 = vector.broadcast %cst_61 : f32 to vector<8x128xf32>
    %152 = arith.mulf %151, %150 : vector<8x128xf32>
    %153 = math.tanh %152 : vector<8x128xf32>
    %cst_62 = arith.constant 5.000000e-01 : f32
    %154 = vector.broadcast %cst_62 : f32 to vector<8x128xf32>
    %155 = arith.mulf %154, %153 : vector<8x128xf32>
    %cst_63 = arith.constant 5.000000e-01 : f32
    %156 = vector.broadcast %cst_63 : f32 to vector<8x128xf32>
    %157 = arith.addf %155, %156 : vector<8x128xf32>
    %158 = vector.extract_strided_slice %141 {offsets = [0, 256], sizes = [8, 128], strides = [1, 1]} : vector<8x512xf32> to vector<8x128xf32>
    %159 = math.tanh %158 : vector<8x128xf32>
    %160 = vector.extract_strided_slice %141 {offsets = [0, 384], sizes = [8, 128], strides = [1, 1]} : vector<8x512xf32> to vector<8x128xf32>
    %cst_64 = arith.constant 5.000000e-01 : f32
    %161 = vector.broadcast %cst_64 : f32 to vector<8x128xf32>
    %162 = arith.mulf %161, %160 : vector<8x128xf32>
    %163 = math.tanh %162 : vector<8x128xf32>
    %cst_65 = arith.constant 5.000000e-01 : f32
    %164 = vector.broadcast %cst_65 : f32 to vector<8x128xf32>
    %165 = arith.mulf %164, %163 : vector<8x128xf32>
    %cst_66 = arith.constant 5.000000e-01 : f32
    %166 = vector.broadcast %cst_66 : f32 to vector<8x128xf32>
    %167 = arith.addf %165, %166 : vector<8x128xf32>
    %168 = arith.mulf %157, %130 : vector<8x128xf32>
    %169 = arith.mulf %149, %159 : vector<8x128xf32>
    %170 = arith.addf %168, %169 : vector<8x128xf32>
    %171 = math.tanh %170 : vector<8x128xf32>
    %172 = arith.mulf %167, %171 : vector<8x128xf32>
    %c4_i32_67 = arith.constant 4 : i32
    %c0_68 = arith.constant 0 : index
    %c0_69 = arith.constant 0 : index
    %173 = vector.load %arg12[%c0_68, %c0_69] : memref<8x128xf32, #tpu.memory_space<vmem>>, vector<8x128xf32>
    tpu.vector_store %arg12[%c0_68, %c0_69], %172 {strides = array<i32>} : memref<8x128xf32, #tpu.memory_space<vmem>>, vector<8x128xf32>,
    %c0_70 = arith.constant 0 : index
    %c0_71 = arith.constant 0 : index
    %174 = vector.load %arg13[%c0_70, %c0_71] : memref<8x128xf32, #tpu.memory_space<vmem>>, vector<8x128xf32>
    tpu.vector_store %arg13[%c0_70, %c0_71], %170 {strides = array<i32>} : memref<8x128xf32, #tpu.memory_space<vmem>>, vector<8x128xf32>,
    %c1_i32_72 = arith.constant 1 : i32
    %175 = arith.cmpi eq, %arg1, %c1_i32_72 : i32
    %176 = arith.extui %175 : i1 to i32
    %c0_i32_73 = arith.constant 0 : i32
    %177 = arith.cmpi ne, %176, %c0_i32_73 : i32
    scf.if %177 {
      %178 = arith.truncf %172 : vector<8x128xf32> to vector<8x128xbf16>
      %c0_74 = arith.constant 0 : index
      %c0_75 = arith.constant 0 : index
      %179 = vector.load %arg7[%c0_74, %c0_75] : memref<128x128xbf16, #tpu.memory_space<vmem>>, vector<128x128xbf16>
      %cst_76 = arith.constant dense<0.000000e+00> : vector<8x128xf32>
      %180 = tpu.matmul %178, %179, %cst_76 {dimension_numbers = #tpu.dot_dimension_numbers<[1], [0], [0], [1], [0, 0, 1, 1], [], []>} : vector<8x128xbf16>, vector<128x128xbf16>, vector<8x128xf32> -> vector<8x128xf32>
      %c0_77 = arith.constant 0 : index
      %c0_78 = arith.constant 0 : index
      %181 = vector.load %arg8[%c0_77, %c0_78] : memref<1x128xf32, #tpu.memory_space<vmem>>, vector<1x128xf32>
      %182 = vector.broadcast %181 : vector<1x128xf32> to vector<8x128xf32>
      %183 = arith.addf %180, %182 : vector<8x128xf32>
      %c0_79 = arith.constant 0 : index
      %c0_80 = arith.constant 0 : index
      %184 = vector.load %arg9[%c0_79, %c0_80] : memref<8x128xf32, #tpu.memory_space<vmem>>, vector<8x128xf32>
      tpu.vector_store %arg9[%c0_79, %c0_80], %183 {strides = array<i32>} : memref<8x128xf32, #tpu.memory_space<vmem>>, vector<8x128xf32>,
    } else {
    }
    return
  }
  func.func @transform_0(%arg0: i32, %arg1: i32, %arg2: memref<64xi32, #tpu.memory_space<smem>>) -> (i32, i32) {
    %c0_i32 = arith.constant 0 : i32
    %c0_i32_0 = arith.constant 0 : i32
    %c0_i32_1 = arith.constant 0 : i32
    return %c0_i32, %c0_i32_0 : i32, i32
  }
  func.func @transform_1(%arg0: i32, %arg1: i32, %arg2: memref<64xi32, #tpu.memory_space<smem>>) -> (i32, i32) {
    %c0_i32 = arith.constant 0 : i32
    %c0_i32_0 = arith.constant 0 : i32
    %c0_i32_1 = arith.constant 0 : i32
    return %c0_i32, %c0_i32_0 : i32, i32
  }
  func.func @transform_2(%arg0: i32, %arg1: i32, %arg2: memref<64xi32, #tpu.memory_space<smem>>) -> (i32, i32) {
    %c0_i32 = arith.constant 0 : i32
    %c0_i32_0 = arith.constant 0 : i32
    %c0_i32_1 = arith.constant 0 : i32
    return %c0_i32, %c0_i32_0 : i32, i32
  }
  func.func @transform_3(%arg0: i32, %arg1: i32, %arg2: memref<64xi32, #tpu.memory_space<smem>>) -> (i32, i32) {
    %c0_i32 = arith.constant 0 : i32
    %c0_i32_0 = arith.constant 0 : i32
    %c0_i32_1 = arith.constant 0 : i32
    return %c0_i32, %c0_i32_0 : i32, i32
  }
  func.func @transform_4(%arg0: i32, %arg1: i32, %arg2: memref<64xi32, #tpu.memory_space<smem>>) -> (i32, i32) {
    %c0_i32 = arith.constant 0 : i32
    %c0_i32_0 = arith.constant 0 : i32
    %c0_i32_1 = arith.constant 0 : i32
    return %c0_i32, %c0_i32_0 : i32, i32
  }
  func.func @transform_5(%arg0: i32, %arg1: i32, %arg2: memref<64xi32, #tpu.memory_space<smem>>) -> (i32, i32) {
    %c0_i32 = arith.constant 0 : i32
    %c0_i32_0 = arith.constant 0 : i32
    %c0_i32_1 = arith.constant 0 : i32
    return %c0_i32, %c0_i32_0 : i32, i32
  }
  func.func @transform_6(%arg0: i32, %arg1: i32, %arg2: memref<64xi32, #tpu.memory_space<smem>>) -> (i32, i32) {
    %c0_i32 = arith.constant 0 : i32
    %c0_i32_0 = arith.constant 0 : i32
    return %arg0, %c0_i32 : i32, i32
  }
}

</mosaic_0001>

<bundles_post_ra>
// kernel: tpu_custom_call.1
= control target key start
LH: loop header
LB: loop body
LE: loop exit
PB: predicated region body
PF: predicated region fallthrough
CT: control target
= control target key end

     0   :  { %s2646_s0 = inlined_call_operand.hbm [shape: s32[64], index: 0, kind: input, shape index: {}]   ;;  %s2647_s1 = inlined_call_operand.hbm [shape: f32[512,128], index: 1, kind: input, shape index: {}]   ;;  %s2648_s2 = inlined_call_operand.hbm [shape: bf16[128,512], index: 2, kind: input, shape index: {}]   ;;  %s2649_s3 = inlined_call_operand.hbm [shape: bf16[128,512], index: 3, kind: input, shape index: {}]   ;;  %s2650_s4 = inlined_call_operand.vmem [shape: f32[1,512], index: 4, kind: input, shape index: {}]   ;;  %s2651_s5 = inlined_call_operand.hbm [shape: bf16[128,128], index: 5, kind: input, shape index: {}]   ;;  %s2652_s6 = inlined_call_operand.vmem [shape: f32[1,128], index: 6, kind: input, shape index: {}]   ;;  %s2653_s7 = inlined_call_operand.hbm [shape: f32[8,128], index: 7, kind: output, shape index: {}]  }
   0x1   :  { %s1905_s26 = scalar_lea.hbm %s2646_s0, 16 }
   0x2   :  { %p1906_p0 = scmp.ne.s32.totalorder %s2646_s0, %s1905_s26  ;;  %p1909_p1 = scmp.lt.u32.totalorder %s1905_s26, %s2646_s0 }
   0x4   :  { %p1911_p2 = pnand %p1909_p1, %p1906_p0 }
   0x6   :  { %1914 = shalt.err (!%p1911_p2)  }
   0x7   :  { %s2103_s8 = smov [#allocation7]  }
   0x8   :  { %13 = dma.hbm_to_smem %s2646_s0, 16, %s2103_s8, [#allocation6] }
   0x9   :  { %2069 = dma.done.wait [#allocation6], 16 }
   0xa   :  { %2070 = vsyncadd [#allocation6], 4294967280 }
   0xb   :  { %15 = sfence }
   0xc   :  { %16 = vsyncpa [#allocation9], 0 }
   0xd   :  { %17 = vsyncpa [#allocation12], 0 }
   0xe   :  { %18 = vsyncpa [#allocation15], 0 }
   0xf   :  { %19 = vsyncpa [#allocation10], 0  ;;  %s2172_s11 = smov 0   ;;  %s2174_s12 = smov 0  }
  0x10   :  { %s2176_s13 = smov 0  }
  0x11 LB: > { %s2104_s0 = smov [#allocation11]   ;;  %s2657_s15 = sadd.s32 4294967295, %s2097_s13   ;;  %s2097_s13 = sphi %s2176_s13, %s25_s13   ;;  %s2093_s12 = sphi %s2174_s12, %s2672_s12   ;;  %s2089_s11 = sphi %s2172_s11, %s2671_s11  }
  0x12   : > { %s219_s14 = sshll.u32 %s2104_s0, 4  ;;  %p1540_p3 = scmp.ge.s32.totalorder %s2097_s13, 1  ;;  %s2196_s14 = int_to_ptr.vmem [resolvable:$true] %s219_s14 }
  0x13   : > { %p194_p4 = scmp.lt.s32.totalorder %s2097_s13, 3  ;;  %p2192_p5 = scmp.eq.s32.totalorder %s2657_s15, 0 }
  0x14   : > { %s34_s19 = sadd.s32 1, %s2093_s12  ;;  %s2105_s21 = smov [#allocation8]  }
  0x15   : > { %s2660_s16 = scalar_select %p2192_p5, 1, 0 }
  0x16   : > { %p2198_p6 = pnand %p1540_p3, %p194_p4  ;;  %p2211_p9 = scmp.ge.s32.totalorder %s34_s19, 2 }
  0x17   : > { %s206_s22 = sshll.u32 %s2105_s21, 4  ;;  %s1915_s25 = scalar_lea.hbm %s2648_s2, 4096  ;;  %s207_s22 = int_to_ptr.vmem [resolvable:$true] %s206_s22 }
  0x18   : > { %s2661_s17 = scalar_select %p2198_p6, 1, 0 }
  0x19   : > { %p1689_p7 = pneg %p2198_p6  ;;  %p1916_p10 = scmp.ne.s32.totalorder %s2648_s2, %s1915_s25 }
  0x1a   : > { %p1922_p0 = scmp.lt.u32.totalorder %s1915_s25, %s2648_s2 }
  0x1b   : > { %p2206_p8 = pnand %p2192_p5, %p1689_p7 }
  0x1d   : > { %p2223_p11 = pneg %p2206_p8 }
  0x1f   : > { %p1918_p12 = pnand %p2223_p11, %p1916_p10 }
  0x21   : > { %p1919_p13 = pneg %p1918_p12 }
  0x23   : > { %p1924_p1 = pnand %p1922_p0, %p1919_p13 }
  0x25   : > { %1927 = shalt.err (!%p1924_p1)
}
  0x26   : > { %s1928_s8 = scalar_lea.vmem %s2196_s14, 4096  ;;  %p1936_p7 = scmp.lt.s32.totalorder %s2196_s14, %s2196_s14 }
  0x27   : > { %p1929_p2 = scmp.ne.s32.totalorder %s2196_s14, %s1928_s8  ;;  %p1937_p5 = scmp.lt.s32.totalorder %s1928_s8, %s1928_s8 }
  0x29   : > { %p1931_p3 = pnand %p1929_p2, %p2223_p11  ;;  %p1938_p10 = por %p1937_p5, %p1936_p7 }
  0x2b   : > { %p1932_p4 = pneg %p1931_p3 }
  0x2d   : > { %p1939_p12 = pnand %p1938_p10, %p1932_p4 }
  0x2f   : > { %1942 = shalt.err (!%p1939_p12)
}
  0x30   : > { %s2658_s9 = smov 256   ;;  %s2659_s10 = smov 16  }
  0x31   : > { %1695 = dma.hbm_to_vmem [thread:$0]  (!%p2206_p8), %s2648_s2, 4096, %s2196_s14, [#allocation12], %s2658_s9, %s2658_s9, %s2659_s10  }
  0x32   : > { %s2674_s19 = smov (%p2211_p9, %s34_s19), 0  ;;  %s1943_s25 = scalar_lea.hbm %s2647_s1, 8192 }
  0x33   : > { %p1944_p5 = scmp.ne.s32.totalorder %s2647_s1, %s1943_s25  ;;  %p1950_p1 = scmp.lt.u32.totalorder %s1943_s25, %s2647_s1 }
  0x35   : > { %p1946_p13 = pnand %p1944_p5, %p2223_p11 }
  0x37   : > { %p1947_p0 = pneg %p1946_p13 }
  0x39   : > { %p1952_p2 = pnand %p1950_p1, %p1947_p0 }
  0x3b   : > { %1955 = shalt.err (!%p1952_p2)
}
  0x3c   : > { %s1956_s14 = scalar_lea.vmem %s207_s22, 8192  ;;  %p1964_p7 = scmp.lt.s32.totalorder %s207_s22, %s207_s22 }
  0x3d   : > { %p1957_p9 = scmp.ne.s32.totalorder %s207_s22, %s1956_s14  ;;  %p1965_p10 = scmp.lt.s32.totalorder %s1956_s14, %s1956_s14 }
  0x3f   : > { %p1959_p3 = pnand %p1957_p9, %p2223_p11  ;;  %p1966_p12 = por %p1965_p10, %p1964_p7 }
  0x41   : > { %p1960_p4 = pneg %p1959_p3 }
  0x43   : > { %p1967_p6 = pnand %p1966_p12, %p1960_p4 }
  0x45   : > { %1970 = shalt.err (!%p1967_p6)
}
  0x46   : > { %s2108_s20 = smov 128   ;;  %s2109_s8 = smov 8  }
  0x47   : > { %1692 = dma.hbm_to_vmem [thread:$0]  (!%p2206_p8), %s2647_s1, 8192, %s207_s22, [#allocation9], %s2108_s20, %s2108_s20, %s2109_s8  }
  0x48   : > { %s2110_s23 = smov [#allocation13]   ;;  %s2111_s25 = smov [#allocation14]  }
  0x49   : > { %s232_s24 = sshll.u32 %s2110_s23, 4  ;;  %s248_s26 = sshll.u32 %s2111_s25, 4  ;;  %s233_s24 = int_to_ptr.vmem [resolvable:$true] %s232_s24  ;;  %s249_s26 = int_to_ptr.vmem [resolvable:$true] %s248_s26 }
  0x4a   : > { %s1971_s30 = scalar_lea.hbm %s2649_s3, 4096 }
  0x4b   : > { %p1972_p6 = scmp.ne.s32.totalorder %s2649_s3, %s1971_s30  ;;  %p1978_p0 = scmp.lt.u32.totalorder %s1971_s30, %s2649_s3 }
  0x4d   : > { %p1974_p5 = pnand %p1972_p6, %p2223_p11 }
  0x4f   : > { %p1975_p13 = pneg %p1974_p5 }
  0x51   : > { %p1980_p1 = pnand %p1978_p0, %p1975_p13 }
  0x53   : > { %1983 = shalt.err (!%p1980_p1)
}
  0x54   : > { %s1984_s22 = scalar_lea.vmem %s233_s24, 4096  ;;  %p1992_p4 = scmp.lt.s32.totalorder %s233_s24, %s233_s24 }
  0x55   : > { %p1985_p2 = scmp.ne.s32.totalorder %s233_s24, %s1984_s22  ;;  %p1993_p7 = scmp.lt.s32.totalorder %s1984_s22, %s1984_s22 }
  0x57   : > { %p1987_p9 = pnand %p1985_p2, %p2223_p11  ;;  %p1994_p10 = por %p1993_p7, %p1992_p4 }
  0x59   : > { %p1988_p3 = pneg %p1987_p9 }
  0x5b   : > { %p1995_p12 = pnand %p1994_p10, %p1988_p3 }
  0x5d   : > { %1998 = shalt.err (!%p1995_p12)
}
  0x5e   : > { %s2665_s15 = smov 16   ;;  %s2666_s20 = smov 256  }
  0x5f   : > { %1698 = dma.hbm_to_vmem [thread:$0]  (!%p2206_p8), %s2649_s3, 4096, %s233_s24, [#allocation12], %s2666_s20, %s2666_s20, %s2665_s15  }
  0x60   : > { %s1999_s21 = scalar_lea.hbm %s2651_s5, 1024 }
  0x61   : > { %p2000_p6 = scmp.ne.s32.totalorder %s2651_s5, %s1999_s21  ;;  %p2006_p0 = scmp.lt.u32.totalorder %s1999_s21, %s2651_s5 }
  0x63   : > { %p2002_p5 = pnand %p2000_p6, %p2223_p11 }
  0x65   : > { %p2003_p13 = pneg %p2002_p5 }
  0x67   : > { %p2008_p1 = pnand %p2006_p0, %p2003_p13 }
  0x69   : > { %2011 = shalt.err (!%p2008_p1)
}
  0x6a   : > { %s2012_s30 = scalar_lea.vmem %s249_s26, 1024  ;;  %p2020_p4 = scmp.lt.s32.totalorder %s249_s26, %s249_s26 }
  0x6b   : > { %p2013_p2 = scmp.ne.s32.totalorder %s249_s26, %s2012_s30  ;;  %p2021_p7 = scmp.lt.s32.totalorder %s2012_s30, %s2012_s30 }
  0x6d   : > { %p2015_p9 = pnand %p2013_p2, %p2223_p11  ;;  %p2022_p10 = por %p2021_p7, %p2020_p4 }
  0x6f   : > { %p2016_p3 = pneg %p2015_p9 }
  0x71   : > { %p2023_p12 = pnand %p2022_p10, %p2016_p3 }
  0x73   : > { %2026 = shalt.err (!%p2023_p12)
}
  0x74   : > { %s2112_s24 = smov 64   ;;  %s2113_s14 = smov 4  }
  0x75   : > { %1701 = dma.hbm_to_vmem [thread:$0]  (!%p2206_p8), %s2651_s5, 1024, %s249_s26, [#allocation15], %s2112_s24, %s2112_s24, %s2113_s14  }
  0x76   : > { %p2667_p6 = scmp.ne.s32.totalorder %s2661_s17, 0 }
  0x77   : > { %p2668_p5 = scmp.ne.s32.totalorder (!%p2667_p6), %s2660_s16, 0 }
  0x78   : > { %267 = sbr.rel (%p2667_p6) target bundleno = 1642 (0x66a), region = 44 }
  0x7f   : > { %2072 = dma.done.wait (%p2668_p5), [#allocation9], 8192  }
  0x80   : > { %2074 = vsyncadd (%p2668_p5), [#allocation9], 4294959104 }
  0x81   : > { %2076 = dma.done.wait (%p2668_p5), [#allocation12], 8192  }
  0x82   : > { %2078 = vsyncadd (%p2668_p5), [#allocation12], 4294959104 }
  0x83   : > { %2080 = dma.done.wait (%p2668_p5), [#allocation15], 1024  }
  0x84   : > { %2082 = vsyncadd (%p2668_p5), [#allocation15], 4294966272  ;;  %s1636_s17 = sshll.u32 %s2089_s11, 5  ;;  %p1552_p8 = scmp.ne.s32.totalorder %s2089_s11, 0 }
  0x85   : > { %v2114_v0 = vmov (!%p1552_p8), 0.0  }
  0x86   : > { %307 = sbr.rel (%p1552_p8) target bundleno = 141 (0x8d), region = 64  ;;  %308 = vst [vmem:[#allocation4] sm:$0xff] (!%p1552_p8), %v2114_v0  ;;  %309 = vst [vmem:[#allocation5] sm:$0xff] (!%p1552_p8), %v2114_v0 }
  0x8d PF: > { %s2324_s18 = smov 0  }
  0x8e LB: >> { %v1761_v1 = vld [vmem:[#allocation11 + $0x4] ss:$16 sps:$4 sm:$0xff]   ;;  %v1763_v2 = vld [vmem:[#allocation11 + $0xc] ss:$16 sps:$4 sm:$0xff]   ;;  %v2115_v3 = vmov 0   ;;  %s1553_s16 = sshll.u32 %s2101_s18, 3  ;;  %s2101_s18 = sphi %s2324_s18, %s315_s18  }
  0x8f   : >> { %583 = vmatprep.mubr.bf16.mxu0 %v2115_v3  ;;  %624 = vmatprep.mubr.bf16.mxu1 %v2115_v3  ;;  %v1765_v4 = vld [vmem:[#allocation11] ss:$16 sps:$4 sm:$0xff]   ;;  %v1766_v5 = vld [vmem:[#allocation11 + $0x8] ss:$16 sps:$4 sm:$0xff]   ;;  %v1767_v6 = vld [vmem:[#allocation11 + $0x24] ss:$16 sps:$4 sm:$0xff]   ;;  %s2332_s28 = sadd.s32 %s1636_s17, %s1553_s16 }
  0x90   : >> { %551 = vmatprep.subr.bf16.mxu0 %v1761_v1  ;;  %592 = vmatprep.subr.bf16.mxu1 %v1763_v2  ;;  %v1769_v7 = vld [vmem:[#allocation11 + $0x2c] ss:$16 sps:$4 sm:$0xff]   ;;  %v1771_v8 = vld [vmem:[#allocation11 + $0x20] ss:$16 sps:$4 sm:$0xff]   ;;  %v1772_v9 = vld [vmem:[#allocation11 + $0x28] ss:$16 sps:$4 sm:$0xff]  }
  0x91   : >> { %552 = vmatpush1.bf16.msra.mxu0 %v1765_v4  ;;  %593 = vmatpush1.bf16.msra.mxu1 %v1766_v5  ;;  %s2335_s26 = sld [smem:[#allocation7 + %s2332_s28]]  ;;  %v1773_v10 = vld [vmem:[#allocation11 + $0x44] ss:$16 sps:$4 sm:$0xff]   ;;  %s322_s20 = sadd.s32 1, %s2332_s28  ;;  %v1775_v11 = vld [vmem:[#allocation11 + $0x4c] ss:$16 sps:$4 sm:$0xff]  }
  0x92   : >> { %553 = vmatprep.subr.bf16.mxu0 %v1767_v6  ;;  %594 = vmatprep.subr.bf16.mxu1 %v1769_v7  ;;  %s327_s9 = sadd.s32 2, %s2332_s28  ;;  %v1777_v12 = vld [vmem:[#allocation11 + $0x40] ss:$16 sps:$4 sm:$0xff]   ;;  %v1778_v13 = vld [vmem:[#allocation11 + $0x48] ss:$16 sps:$4 sm:$0xff]   ;;  %s332_s10 = sadd.s32 3, %s2332_s28 }
  0x93   : >> { %v1779_v14 = vld [vmem:[#allocation11 + $0x64] ss:$16 sps:$4 sm:$0xff]   ;;  %s337_s8 = sadd.s32 4, %s2332_s28  ;;  %v1781_v15 = vld [vmem:[#allocation11 + $0x6c] ss:$16 sps:$4 sm:$0xff]   ;;  %s2341_s0 = sld [smem:[#allocation7 + %s322_s20]] }
  0x94   : >> { %s2343_s21 = sld [smem:[#allocation7 + %s327_s9]]  ;;  %v1783_v16 = vld [vmem:[#allocation11 + $0x60] ss:$16 sps:$4 sm:$0xff]   ;;  %s342_s27 = sadd.s32 5, %s2332_s28  ;;  %v1784_v17 = vld [vmem:[#allocation11 + $0x68] ss:$16 sps:$4 sm:$0xff]  }
  0x95   : >> { %554 = vmatpush1.bf16.msra.mxu0 %v1771_v8  ;;  %595 = vmatpush1.bf16.msra.mxu1 %v1772_v9  ;;  %s2345_s23 = sld [smem:[#allocation7 + %s332_s10]]  ;;  %s347_s29 = sadd.s32 6, %s2332_s28  ;;  %v1785_v18 = vld [vmem:[#allocation11 + $0x84] ss:$16 sps:$4 sm:$0xff]   ;;  %v1787_v19 = vld [vmem:[#allocation11 + $0x8c] ss:$16 sps:$4 sm:$0xff]  }
  0x96   : >> { %555 = vmatprep.subr.bf16.mxu0 %v1773_v10  ;;  %596 = vmatprep.subr.bf16.mxu1 %v1775_v11  ;;  %s2347_s25 = sld [smem:[#allocation7 + %s337_s8]]  ;;  %s352_s14 = sadd.s32 7, %s2332_s28  ;;  %v1789_v20 = vld [vmem:[#allocation11 + $0x80] ss:$16 sps:$4 sm:$0xff]   ;;  %v1790_v21 = vld [vmem:[#allocation11 + $0x88] ss:$16 sps:$4 sm:$0xff]  }
  0x97   : >> { %s2351_s30 = sld [smem:[#allocation7 + %s342_s27]]  ;;  %v1791_v22 = vld [vmem:[#allocation11 + $0xa4] ss:$16 sps:$4 sm:$0xff]   ;;  %v1793_v23 = vld [vmem:[#allocation11 + $0xac] ss:$16 sps:$4 sm:$0xff]   ;;  %s319_s15 = scalar_lea.vmem [#allocation8], %s2335_s26 }
  0x98   : >> { %s2353_s24 = sld [smem:[#allocation7 + %s347_s29]]  ;;  %v1795_v24 = vld [vmem:[#allocation11 + $0xa0] ss:$16 sps:$4 sm:$0xff]   ;;  %v1796_v25 = vld [vmem:[#allocation11 + $0xa8] ss:$16 sps:$4 sm:$0xff]  }
  0x99   : >> { %556 = vmatpush1.bf16.msra.mxu0 %v1777_v12  ;;  %597 = vmatpush1.bf16.msra.mxu1 %v1778_v13  ;;  %s2356_s22 = sld [smem:[#allocation7 + %s352_s14]]  ;;  %v1797_v26 = vld [vmem:[#allocation11 + $0xc4] ss:$16 sps:$4 sm:$0xff]   ;;  %v1799_v27 = vld [vmem:[#allocation11 + $0xcc] ss:$16 sps:$4 sm:$0xff]   ;;  %s324_s16 = scalar_lea.vmem [#allocation8], %s2341_s0 }
  0x9a   : >> { %557 = vmatprep.subr.bf16.mxu0 %v1779_v14  ;;  %598 = vmatprep.subr.bf16.mxu1 %v1781_v15  ;;  %v320_v28 = vld [vmem:[%s319_s15] sm:$0x1]  ;;  %s329_s28 = scalar_lea.vmem [#allocation8], %s2343_s21  ;;  %v1802_v36 = vld [vmem:[#allocation11 + $0xc8] ss:$16 sps:$4 sm:$0xff]   ;;  %s1639_s0 = sshll.u32 %s2101_s18, 4 }
  0x9b   : >> { %v325_v29 = vld [vmem:[%s324_s16] sm:$0x1]  ;;  %321 = vst [vmem:[#allocation2] sm:$0x1] %v320_v28  ;;  %s334_s20 = scalar_lea.vmem [#allocation8], %s2345_s23  ;;  %s651_s21 = scalar_lea.vmem [#allocation3], %s1639_s0 }
  0x9c   : >> { %326 = vst [vmem:[#allocation2 + $0x1] sm:$0x1] %v325_v29  ;;  %v330_v30 = vld [vmem:[%s329_s28] sm:$0x1]  ;;  %s339_s9 = scalar_lea.vmem [#allocation8], %s2347_s25  ;;  %s315_s18 = sadd.s32 1, %s2101_s18  }
  0x9d   : >> { %558 = vmatpush1.bf16.msra.mxu0 %v1783_v16  ;;  %599 = vmatpush1.bf16.msra.mxu1 %v1784_v17  ;;  %v335_v31 = vld [vmem:[%s334_s20] sm:$0x1]  ;;  %331 = vst [vmem:[#allocation2 + $0x2] sm:$0x1] %v330_v30  ;;  %s344_s10 = scalar_lea.vmem [#allocation8], %s2351_s30  ;;  %p312_p11 = scmp.ge.s32.totalorder %s315_s18, 4  }
  0x9e   : >> { %559 = vmatprep.subr.bf16.mxu0 %v1785_v18  ;;  %600 = vmatprep.subr.bf16.mxu1 %v1787_v19  ;;  %v340_v32 = vld [vmem:[%s339_s9] sm:$0x1]  ;;  %336 = vst [vmem:[#allocation2 + $0x3] sm:$0x1] %v335_v31  ;;  %s349_s8 = scalar_lea.vmem [#allocation8], %s2353_s24  ;;  %v2116_v56 = vmov (%p312_p11), 0  }
  0x9f   : >> { %341 = vst [vmem:[#allocation2 + $0x4] sm:$0x1] %v340_v32  ;;  %v345_v33 = vld [vmem:[%s344_s10] sm:$0x1]  ;;  %s354_s26 = scalar_lea.vmem [#allocation8], %s2356_s22  ;;  %p1622_p13 = scmp.ne.s32.totalorder (%p312_p11), %s2089_s11, 1 }
  0xa0   : >> { %v350_v34 = vld [vmem:[%s349_s8] sm:$0x1]  ;;  %346 = vst [vmem:[#allocation2 + $0x5] sm:$0x1] %v345_v33  ;;  %v1803_v38 = vld [vmem:[#allocation11 + $0xe4] ss:$16 sps:$4 sm:$0xff]  }
  0xa1   : >> { %560 = vmatpush1.bf16.msra.mxu0 %v1789_v20  ;;  %601 = vmatpush1.bf16.msra.mxu1 %v1790_v21  ;;  %v1801_v35 = vld [vmem:[#allocation11 + $0xc0] ss:$16 sps:$4 sm:$0xff]   ;;  %351 = vst [vmem:[#allocation2 + $0x6] sm:$0x1] %v350_v34  ;;  %v1805_v39 = vld [vmem:[#allocation11 + $0xec] ss:$16 sps:$4 sm:$0xff]  }
  0xa2   : >> { %561 = vmatprep.subr.bf16.mxu0 %v1791_v22  ;;  %602 = vmatprep.subr.bf16.mxu1 %v1793_v23  ;;  %v355_v37 = vld [vmem:[%s354_s26] sm:$0x1]  ;;  %v1808_v41 = vld [vmem:[#allocation11 + $0xe8] ss:$16 sps:$4 sm:$0xff]   ;;  %v2370_v54 = vld [vmem:[#allocation13 + $0x4] ss:$16 sps:$4 sm:$0xff] (%p312_p11)  }
  0xa3   : >> { %356 = vst [vmem:[#allocation2 + $0x7] sm:$0x1] %v355_v37  ;;  %v1807_v40 = vld [vmem:[#allocation11 + $0xe0] ss:$16 sps:$4 sm:$0xff]   ;;  %v2377_v57 = vld [vmem:[#allocation13 + $0x24] ss:$16 sps:$4 sm:$0xff] (%p312_p11)  }
  0xa4   : > { %v2372_v55 = vld [vmem:[#allocation13] ss:$16 sps:$4 sm:$0xff] (%p312_p11)   ;;  %v2380_v58 = vld [vmem:[#allocation13 + $0xc] ss:$16 sps:$4 sm:$0xff] (%p312_p11)   ;;  %v2384_v60 = vld [vmem:[#allocation13 + $0x8] ss:$16 sps:$4 sm:$0xff] (%p312_p11)  }
  0xa5   : >> { %562 = vmatpush1.bf16.msra.mxu0 %v1795_v24  ;;  %603 = vmatpush1.bf16.msra.mxu1 %v1796_v25  ;;  %v2382_v59 = vld [vmem:[#allocation13 + $0x20] ss:$16 sps:$4 sm:$0xff] (%p312_p11)   ;;  %v2387_v61 = vld [vmem:[#allocation13 + $0x44] ss:$16 sps:$4 sm:$0xff] (%p312_p11)   ;;  %v2390_v62 = vld [vmem:[#allocation13 + $0x2c] ss:$16 sps:$4 sm:$0xff] (%p312_p11)   ;;  %v656_v25 = vlaneseq (%p312_p11) }
  0xa6   : >> { %563 = vmatprep.subr.bf16.mxu0 %v1797_v26  ;;  %604 = vmatprep.subr.bf16.mxu1 %v1799_v27  ;;  %v2393_v63 = vld [vmem:[#allocation13 + $0x28] ss:$16 sps:$4 sm:$0xff] (%p312_p11)   ;;  %v2397_v0 = vld [vmem:[#allocation13 + $0x40] ss:$16 sps:$4 sm:$0xff] (%p312_p11)   ;;  %v2400_v1 = vld [vmem:[#allocation13 + $0x64] ss:$16 sps:$4 sm:$0xff] (%p312_p11)  }
  0xa7   : > { %v2402_v2 = vld [vmem:[#allocation13 + $0x4c] ss:$16 sps:$4 sm:$0xff] (%p312_p11)   ;;  %v2405_v3 = vld [vmem:[#allocation13 + $0x48] ss:$16 sps:$4 sm:$0xff] (%p312_p11)   ;;  %v2409_v4 = vld [vmem:[#allocation13 + $0x60] ss:$16 sps:$4 sm:$0xff] (%p312_p11)  }
  0xa8   : > { %v2411_v5 = vld [vmem:[#allocation13 + $0x6c] ss:$16 sps:$4 sm:$0xff] (%p312_p11)   ;;  %v2414_v6 = vld [vmem:[#allocation13 + $0x84] ss:$16 sps:$4 sm:$0xff] (%p312_p11)   ;;  %v2417_v7 = vld [vmem:[#allocation13 + $0x80] ss:$16 sps:$4 sm:$0xff] (%p312_p11)  }
  0xa9   : >> { %564 = vmatpush1.bf16.msra.mxu0 %v1801_v35  ;;  %605 = vmatpush1.bf16.msra.mxu1 %v1802_v36  ;;  %v2419_v8 = vld [vmem:[#allocation13 + $0x68] ss:$16 sps:$4 sm:$0xff] (%p312_p11)   ;;  %v2423_v9 = vld [vmem:[#allocation13 + $0x8c] ss:$16 sps:$4 sm:$0xff] (%p312_p11)   ;;  %v2426_v10 = vld [vmem:[#allocation13 + $0xa4] ss:$16 sps:$4 sm:$0xff] (%p312_p11)  }
  0xaa   : >> { %565 = vmatprep.subr.bf16.mxu0 %v1803_v38  ;;  %606 = vmatprep.subr.bf16.mxu1 %v1805_v39  ;;  %v357_v42 = vld [vmem:[#allocation2] sm:$0xff]  ;;  %v2433_v12 = vld [vmem:[#allocation13 + $0xa0] ss:$16 sps:$4 sm:$0xff] (%p312_p11)   ;;  %v2438_v14 = vld [vmem:[#allocation13 + $0xc4] ss:$16 sps:$4 sm:$0xff] (%p312_p11)   ;;  %v657_v26 = vshrl.u32 (%p312_p11), %v656_v25, 7 }
  0xab   : >> { %v358_v43 = vpack.c.bf16 %v357_v42, %v357_v42  ;;  %v2429_v11 = vld [vmem:[#allocation13 + $0x88] ss:$16 sps:$4 sm:$0xff] (%p312_p11)   ;;  %v2435_v13 = vld [vmem:[#allocation13 + $0xac] ss:$16 sps:$4 sm:$0xff] (%p312_p11)   ;;  %v2445_v16 = vld [vmem:[#allocation13 + $0xc0] ss:$16 sps:$4 sm:$0xff] (%p312_p11)  }
  0xac   : > { %v2441_v15 = vld [vmem:[#allocation13 + $0xa8] ss:$16 sps:$4 sm:$0xff] (%p312_p11)   ;;  %v2447_v17 = vld [vmem:[#allocation13 + $0xcc] ss:$16 sps:$4 sm:$0xff] (%p312_p11)   ;;  %v2450_v18 = vld [vmem:[#allocation13 + $0xe4] ss:$16 sps:$4 sm:$0xff] (%p312_p11)  }
  0xad   : >> { %566 = vmatpush1.bf16.msra.mxu0 %v1807_v40  ;;  %607 = vmatpush1.bf16.msra.mxu1 %v1808_v41  ;;  %v2453_v19 = vld [vmem:[#allocation13 + $0xc8] ss:$16 sps:$4 sm:$0xff] (%p312_p11)   ;;  %v2457_v20 = vld [vmem:[#allocation13 + $0xe0] ss:$16 sps:$4 sm:$0xff] (%p312_p11)   ;;  %v2459_v22 = vld [vmem:[#allocation13 + $0xec] ss:$16 sps:$4 sm:$0xff] (%p312_p11)  }
  0xae   : > { %877 = vmatprep.subr.bf16.mxu0 (%p312_p11), %v2370_v54  ;;  %918 = vmatprep.subr.bf16.mxu1 (%p312_p11), %v2380_v58  ;;  %v676_v21 = vld [vmem:[#allocation4] sm:$0xff] (%p312_p11)  ;;  %v2463_v24 = vld [vmem:[#allocation13 + $0xe8] ss:$16 sps:$4 sm:$0xff] (%p312_p11)   ;;  %v658_v28 = vsub.s32 (%p312_p11), 0, %v657_v26  ;;  %v654_v29 = vld [vmem:[%s2650_s4] sm:$0xf] (%p312_p11) }
  0xaf   : > { %v678_v23 = vpack.c.bf16 (%p312_p11), %v676_v21, %v676_v21  ;;  %v662_v30 = vsub.s32 (%p312_p11), 1, %v657_v26  ;;  %v666_v34 = vsub.s32 (%p312_p11), 2, %v657_v26 }
  0xb0   : >> { %584 = vmatmul.mubr.bf16.vlgmr.msra.gmra.mrb[0].mxu0 %v358_v43  ;;  %625 = vmatmul.mubr.bf16.vlgmr.msra.gmra.mrb[0].mxu1 %v358_v43  ;;  %v2507_v35 = vrot.slane (%p312_p11), %v654_v29, %v658_v28 }
  0xb1   : > { %909 = vmatprep.mubr.bf16.mxu0 (%p312_p11), %v2116_v56  ;;  %950 = vmatprep.mubr.bf16.mxu1 (%p312_p11), %v2116_v56  ;;  %v2509_v37 = vrot.slane (%p312_p11), %v654_v29, %v662_v30  ;;  %v2511_v43 = vrot.slane (%p312_p11), %v654_v29, %v666_v34 }
  0xb2   : > { %878 = vmatpush1.bf16.msra.mxu0 (%p312_p11), %v2372_v55  ;;  %919 = vmatpush1.bf16.msra.mxu1 (%p312_p11), %v2384_v60 }
  0xb3   : > { %879 = vmatprep.subr.bf16.mxu0 (%p312_p11), %v2377_v57  ;;  %920 = vmatprep.subr.bf16.mxu1 (%p312_p11), %v2390_v62 }
  0xb6   : > { %880 = vmatpush1.bf16.msra.mxu0 (%p312_p11), %v2382_v59  ;;  %921 = vmatpush1.bf16.msra.mxu1 (%p312_p11), %v2393_v63 }
  0xb7   : > { %881 = vmatprep.subr.bf16.mxu0 (%p312_p11), %v2387_v61  ;;  %922 = vmatprep.subr.bf16.mxu1 (%p312_p11), %v2402_v2 }
  0xba   : > { %882 = vmatpush1.bf16.msra.mxu0 (%p312_p11), %v2397_v0  ;;  %923 = vmatpush1.bf16.msra.mxu1 (%p312_p11), %v2405_v3 }
  0xbb   : > { %883 = vmatprep.subr.bf16.mxu0 (%p312_p11), %v2400_v1  ;;  %924 = vmatprep.subr.bf16.mxu1 (%p312_p11), %v2411_v5 }
  0xbe   : > { %884 = vmatpush1.bf16.msra.mxu0 (%p312_p11), %v2409_v4  ;;  %925 = vmatpush1.bf16.msra.mxu1 (%p312_p11), %v2419_v8 }
  0xbf   : > { %885 = vmatprep.subr.bf16.mxu0 (%p312_p11), %v2414_v6  ;;  %926 = vmatprep.subr.bf16.mxu1 (%p312_p11), %v2423_v9 }
  0xc2   : > { %886 = vmatpush1.bf16.msra.mxu0 (%p312_p11), %v2417_v7  ;;  %927 = vmatpush1.bf16.msra.mxu1 (%p312_p11), %v2429_v11 }
  0xc3   : > { %887 = vmatprep.subr.bf16.mxu0 (%p312_p11), %v2426_v10  ;;  %928 = vmatprep.subr.bf16.mxu1 (%p312_p11), %v2435_v13 }
  0xc6   : > { %888 = vmatpush1.bf16.msra.mxu0 (%p312_p11), %v2433_v12  ;;  %929 = vmatpush1.bf16.msra.mxu1 (%p312_p11), %v2441_v15 }
  0xc7   : > { %889 = vmatprep.subr.bf16.mxu0 (%p312_p11), %v2438_v14  ;;  %930 = vmatprep.subr.bf16.mxu1 (%p312_p11), %v2447_v17 }
  0xca   : > { %890 = vmatpush1.bf16.msra.mxu0 (%p312_p11), %v2445_v16  ;;  %931 = vmatpush1.bf16.msra.mxu1 (%p312_p11), %v2453_v19 }
  0xcb   : > { %891 = vmatprep.subr.bf16.mxu0 (%p312_p11), %v2450_v18  ;;  %932 = vmatprep.subr.bf16.mxu1 (%p312_p11), %v2459_v22 }
  0xce   : > { %892 = vmatpush1.bf16.msra.mxu0 (%p312_p11), %v2457_v20  ;;  %933 = vmatpush1.bf16.msra.mxu1 (%p312_p11), %v2463_v24 }
  0xcf   : > { %989 = vmatprep.subr.bf16.mxu0 (%p312_p11), %v2370_v54  ;;  %1030 = vmatprep.subr.bf16.mxu1 (%p312_p11), %v2380_v58 }
 0x181   : > { %314 = sbr.rel (!%p312_p11) target bundleno = 142 (0x8e), region = 113 }
 0x183   : >> { %v585_v44 = vpop.f32.mrb[0].mxu0  ;;  %v626_v45 = vpop.f32.mrb[0].mxu1 }
 0x184   : >> { %v587_v46 = vpop.f32.mrb[1].mxu0  ;;  %v628_v47 = vpop.f32.mrb[1].mxu1 }
 0x185   : >> { %v1637_v48 = vpack.c.bf16 %v587_v46, %v585_v44  ;;  %v1638_v49 = vpack.c.bf16 %v628_v47, %v626_v45  ;;  %v589_v50 = vpop.f32.mrb[2].mxu0  ;;  %v630_v51 = vpop.f32.mrb[2].mxu1  ;;  %v670_v47 = vsub.s32 (%p312_p11), 3, %v657_v26 }
 0x186   : >> { %v590_v52 = vpop.f32.mrb[3].mxu0  ;;  %v631_v53 = vpop.f32.mrb[3].mxu1  ;;  %910 = vmatmul.mubr.bf16.vlgmr.msra.gmra.mrb[0].mxu0 (%p312_p11), %v678_v23  ;;  %951 = vmatmul.mubr.bf16.vlgmr.msra.gmra.mrb[0].mxu1 (%p312_p11), %v678_v23 }
 0x187   : >> { %652 = vst [vmem:[%s651_s21] sm:$0xff] %v1637_v48  ;;  %653 = vst [vmem:[%s651_s21 + $0x8] sm:$0xff] %v1638_v49  ;;  %990 = vmatpush1.bf16.msra.mxu0 (%p312_p11), %v2372_v55  ;;  %1021 = vmatprep.mubr.bf16.mxu0 (%p312_p11), %v2116_v56 }
 0x188   : > { %991 = vmatprep.subr.bf16.mxu0 %v2377_v57  ;;  %1031 = vmatpush1.bf16.msra.mxu1 %v2384_v60  ;;  %vm2118_vm0 = vmmov (!%p1622_p13), 0  }
 0x189   : > { %1062 = vmatprep.mubr.bf16.mxu1 %v2116_v56  ;;  %1032 = vmatprep.subr.bf16.mxu1 %v2390_v62 }
 0x18b   : > { %992 = vmatpush1.bf16.msra.mxu0 %v2382_v59 }
 0x18c   : > { %993 = vmatprep.subr.bf16.mxu0 %v2387_v61  ;;  %1033 = vmatpush1.bf16.msra.mxu1 %v2393_v63 }
 0x18d   : > { %1034 = vmatprep.subr.bf16.mxu1 %v2402_v2 }
 0x18e   : > { %v711_v27 = vld [vmem:[#allocation3] sm:$0xff]  ;;  %v712_v32 = vld [vmem:[#allocation3 + $0x8] sm:$0xff] }
 0x18f   : > { %994 = vmatpush1.bf16.msra.mxu0 %v2397_v0  ;;  %v713_v31 = vunpack.c.l.bf16 %v711_v27  ;;  %v714_v33 = vunpack.c.h.bf16 %v711_v27  ;;  %v715_v38 = vunpack.c.l.bf16 %v712_v32  ;;  %v716_v48 = vunpack.c.h.bf16 %v712_v32 }
 0x190   : > { %995 = vmatprep.subr.bf16.mxu0 %v2400_v1  ;;  %1035 = vmatpush1.bf16.msra.mxu1 %v2405_v3  ;;  %v2516_v27 = vrot.slane %v654_v29, %v670_v47 }
 0x191   : > { %1036 = vmatprep.subr.bf16.mxu1 %v2411_v5 }
 0x193   : > { %996 = vmatpush1.bf16.msra.mxu0 %v2409_v4 }
 0x194   : > { %997 = vmatprep.subr.bf16.mxu0 %v2414_v6  ;;  %1037 = vmatpush1.bf16.msra.mxu1 %v2419_v8 }
 0x195   : > { %1038 = vmatprep.subr.bf16.mxu1 %v2423_v9 }
 0x197   : > { %998 = vmatpush1.bf16.msra.mxu0 %v2417_v7 }
 0x198   : > { %999 = vmatprep.subr.bf16.mxu0 %v2426_v10  ;;  %1039 = vmatpush1.bf16.msra.mxu1 %v2429_v11 }
 0x199   : > { %1040 = vmatprep.subr.bf16.mxu1 %v2435_v13 }
 0x19b   : > { %1000 = vmatpush1.bf16.msra.mxu0 %v2433_v12 }
 0x19c   : > { %1001 = vmatprep.subr.bf16.mxu0 %v2438_v14  ;;  %1041 = vmatpush1.bf16.msra.mxu1 %v2441_v15 }
 0x19d   : > { %1042 = vmatprep.subr.bf16.mxu1 %v2447_v17 }
 0x19f   : > { %1002 = vmatpush1.bf16.msra.mxu0 %v2445_v16 }
 0x1a0   : > { %1003 = vmatprep.subr.bf16.mxu0 %v2450_v18  ;;  %1043 = vmatpush1.bf16.msra.mxu1 %v2453_v19 }
 0x1a1   : > { %1044 = vmatprep.subr.bf16.mxu1 %v2459_v22 }
 0x1a3   : > { %1004 = vmatpush1.bf16.msra.mxu0 %v2457_v20 }
 0x1a4   : > { %1101 = vmatprep.subr.bf16.mxu0 %v2370_v54  ;;  %1045 = vmatpush1.bf16.msra.mxu1 %v2463_v24 }
 0x1a5   : > { %1142 = vmatprep.subr.bf16.mxu1 %v2380_v58 }
 0x259   : > { %v911_v36 = vpop.f32.mrb[0].mxu0  ;;  %v952_v46 = vpop.f32.mrb[0].mxu1 }
 0x25a   : > { %v912_v39 = vadd.f32 %v911_v36, %v713_v31  ;;  %v913_v40 = vpop.f32.mrb[1].mxu0  ;;  %v953_v50 = vadd.f32 %v952_v46, %v715_v38  ;;  %v954_v51 = vpop.f32.mrb[1].mxu1 }
 0x25b   : > { %v914_v41 = vadd.f32 %v913_v40, %v714_v33  ;;  %v915_v42 = vpop.f32.mrb[2].mxu0  ;;  %v956_v53 = vpop.f32.mrb[2].mxu1  ;;  %v955_v28 = vadd.f32 %v954_v51, %v716_v48  ;;  %v984_v51 = vld [vmem:[#allocation3 + $0x18] sm:$0xff] }
 0x25c   : > { %v959_v44 = vadd.f32 %v912_v39, %v2507_v35  ;;  %v916_v45 = vpop.f32.mrb[3].mxu0  ;;  %v961_v23 = vadd.f32 %v953_v50, %v2511_v43  ;;  %v957_v25 = vpop.f32.mrb[3].mxu1  ;;  %v677_v39 = vld [vmem:[#allocation5] sm:$0xff]  ;;  %v983_v50 = vld [vmem:[#allocation3 + $0x10] sm:$0xff] }
 0x25d   : > { %v960_v49 = vadd.f32 %v914_v41, %v2509_v37  ;;  %v962_v30 = vadd.f32 %v955_v28, %v2516_v27  ;;  %v986_v53 = vunpack.c.h.bf16 %v983_v50 }
 0x25e   : > { %v963_v52 = vmul.f32 0.5, %v959_v44 }
 0x25f   : > { %v967_v21 = vmul.f32 0.5, %v960_v49  ;;  %v972_v26 = vmul.f32 0.5, %v962_v30 }
 0x260   : > { %1857 = vtanh.f32 %v963_v52  ;;  %v985_v52 = vunpack.c.l.bf16 %v983_v50 }
 0x261   : > { %1859 = vtanh.f32 %v967_v21  ;;  %v987_v21 = vunpack.c.l.bf16 %v984_v51 }
 0x262   : > { %1861 = vtanh.f32 %v961_v23 }
 0x263   : > { %1863 = vtanh.f32 %v972_v26 }
 0x26a   : > { %v1858_v31 = vpop.eup %1857 }
 0x26b   : > { %v1860_v32 = vpop.eup %1859  ;;  %v965_v33 = vmul.f32 0.5, %v1858_v31 }
 0x26c   : > { %v1862_v34 = vpop.eup %1861  ;;  %v969_v36 = vmul.f32 0.5, %v1860_v32 }
 0x26d   : > { %v966_v38 = vadd.f32 0.5, %v965_v33  ;;  %v1864_v29 = vpop.eup %1863 }
 0x26e   : > { %v970_v40 = vadd.f32 0.5, %v969_v36  ;;  %v974_v45 = vmul.f32 0.5, %v1864_v29 }
 0x26f   : > { %v977_v41 = vmul.f32 %v1862_v34, %v966_v38  ;;  %v988_v38 = vunpack.c.h.bf16 %v984_v51 }
 0x270   : > { %v976_v42 = vmul.f32 %v970_v40, %v677_v39  ;;  %v975_v46 = vadd.f32 0.5, %v974_v45 }
 0x272   : > { %v2519_v44 = vadd.f32 %v977_v41, %v976_v42 }
 0x274   : > { %1865 = vtanh.f32 %v2519_v44 }
 0x27e   : > { %v1866_v47 = vpop.eup %1865 }
 0x27f   : > { %v980_v48 = vmul.f32 %v1866_v47, %v975_v46 }
 0x281   : > { %v981_v49 = vpack.c.bf16 %v980_v48, %v980_v48 }
 0x283   : > { %1022 = vmatmul.mubr.bf16.vlgmr.msra.gmra.mrb[4].mxu0 %v981_v49  ;;  %1063 = vmatmul.mubr.bf16.vlgmr.msra.gmra.mrb[4].mxu1 %v981_v49 }
 0x284   : > { %1102 = vmatpush1.bf16.msra.mxu0 %v2372_v55  ;;  %1143 = vmatpush1.bf16.msra.mxu1 %v2384_v60 }
 0x285   : > { %1103 = vmatprep.subr.bf16.mxu0 %v2377_v57  ;;  %1144 = vmatprep.subr.bf16.mxu1 %v2390_v62 }
 0x286   : > { %1133 = vmatprep.mubr.bf16.mxu0 %v2116_v56  ;;  %1174 = vmatprep.mubr.bf16.mxu1 %v2116_v56 }
 0x288   : > { %1104 = vmatpush1.bf16.msra.mxu0 %v2382_v59  ;;  %1145 = vmatpush1.bf16.msra.mxu1 %v2393_v63 }
 0x289   : > { %1105 = vmatprep.subr.bf16.mxu0 %v2387_v61  ;;  %1146 = vmatprep.subr.bf16.mxu1 %v2402_v2 }
 0x28c   : > { %1106 = vmatpush1.bf16.msra.mxu0 %v2397_v0  ;;  %1147 = vmatpush1.bf16.msra.mxu1 %v2405_v3 }
 0x28d   : > { %1107 = vmatprep.subr.bf16.mxu0 %v2400_v1  ;;  %1148 = vmatprep.subr.bf16.mxu1 %v2411_v5 }
 0x290   : > { %1108 = vmatpush1.bf16.msra.mxu0 %v2409_v4  ;;  %1149 = vmatpush1.bf16.msra.mxu1 %v2419_v8 }
 0x291   : > { %1109 = vmatprep.subr.bf16.mxu0 %v2414_v6  ;;  %1150 = vmatprep.subr.bf16.mxu1 %v2423_v9 }
 0x294   : > { %1110 = vmatpush1.bf16.msra.mxu0 %v2417_v7  ;;  %1151 = vmatpush1.bf16.msra.mxu1 %v2429_v11 }
 0x295   : > { %1111 = vmatprep.subr.bf16.mxu0 %v2426_v10  ;;  %1152 = vmatprep.subr.bf16.mxu1 %v2435_v13 }
 0x298   : > { %1112 = vmatpush1.bf16.msra.mxu0 %v2433_v12  ;;  %1153 = vmatpush1.bf16.msra.mxu1 %v2441_v15 }
 0x299   : > { %1113 = vmatprep.subr.bf16.mxu0 %v2438_v14  ;;  %1154 = vmatprep.subr.bf16.mxu1 %v2447_v17 }
 0x29c   : > { %1114 = vmatpush1.bf16.msra.mxu0 %v2445_v16  ;;  %1155 = vmatpush1.bf16.msra.mxu1 %v2453_v19 }
 0x29d   : > { %1115 = vmatprep.subr.bf16.mxu0 %v2450_v18  ;;  %1156 = vmatprep.subr.bf16.mxu1 %v2459_v22 }
 0x2a0   : > { %1116 = vmatpush1.bf16.msra.mxu0 %v2457_v20  ;;  %1157 = vmatpush1.bf16.msra.mxu1 %v2463_v24 }
 0x2a1   : > { %1213 = vmatprep.subr.bf16.mxu0 %v2370_v54  ;;  %1254 = vmatprep.subr.bf16.mxu1 %v2380_v58 }
 0x356   : > { %v1023_v23 = vpop.f32.mrb[4].mxu0  ;;  %v1064_v25 = vpop.f32.mrb[4].mxu1 }
 0x357   : > { %v1024_v28 = vadd.f32 %v1023_v23, %v985_v52  ;;  %v1025_v30 = vpop.f32.mrb[5].mxu0  ;;  %v1066_v26 = vpop.f32.mrb[5].mxu1  ;;  %v1065_v36 = vadd.f32 %v1064_v25, %v987_v21 }
 0x358   : > { %v1026_v31 = vadd.f32 %v1025_v30, %v986_v53  ;;  %v1027_v32 = vpop.f32.mrb[6].mxu0  ;;  %v1068_v33 = vpop.f32.mrb[6].mxu1  ;;  %v1067_v29 = vadd.f32 %v1066_v26, %v988_v38 }
 0x359   : > { %v1071_v34 = vadd.f32 %v1024_v28, %v2507_v35  ;;  %v1028_v54 = vpop.f32.mrb[7].mxu0  ;;  %v1069_v39 = vpop.f32.mrb[7].mxu1  ;;  %v1073_v42 = vadd.f32 %v1065_v36, %v2511_v43 }
 0x35a   : > { %v1072_v58 = vadd.f32 %v1026_v31, %v2509_v37  ;;  %v1074_v45 = vadd.f32 %v1067_v29, %v2516_v27  ;;  %v1207_v29 = vld [vmem:[#allocation3 + $0x30] sm:$0xff] }
 0x35b   : > { %v1075_v40 = vmul.f32 0.5, %v1071_v34 }
 0x35c   : > { %v1079_v41 = vmul.f32 0.5, %v1072_v58  ;;  %v1084_v46 = vmul.f32 0.5, %v1074_v45  ;;  %v1208_v45 = vld [vmem:[#allocation3 + $0x38] sm:$0xff] }
 0x35d   : > { %1867 = vtanh.f32 %v1075_v40 }
 0x35e   : > { %1869 = vtanh.f32 %v1079_v41 }
 0x35f   : > { %1871 = vtanh.f32 %v1073_v42 }
 0x360   : > { %1873 = vtanh.f32 %v1084_v46  ;;  %v1209_v46 = vunpack.c.l.bf16 %v1207_v29 }
 0x367   : > { %v1868_v47 = vpop.eup %1867 }
 0x368   : > { %v1870_v48 = vpop.eup %1869  ;;  %v1077_v49 = vmul.f32 0.5, %v1868_v47  ;;  %v1210_v47 = vunpack.c.h.bf16 %v1207_v29 }
 0x369   : > { %v1081_v50 = vmul.f32 0.5, %v1870_v48  ;;  %v1872_v52 = vpop.eup %1871  ;;  %v1211_v48 = vunpack.c.l.bf16 %v1208_v45 }
 0x36a   : > { %v1078_v51 = vadd.f32 0.5, %v1077_v49  ;;  %v1874_v28 = vpop.eup %1873 }
 0x36b   : > { %v1082_v53 = vadd.f32 0.5, %v1081_v50  ;;  %v1086_v30 = vmul.f32 0.5, %v1874_v28 }
 0x36c   : > { %v1089_v21 = vmul.f32 %v1872_v52, %v1078_v51 }
 0x36d   : > { %v1088_v23 = vmul.f32 %v1082_v53, %v2519_v44  ;;  %v1087_v26 = vadd.f32 0.5, %v1086_v30 }
 0x36f   : > { %v2561_v25 = vadd.f32 %v1089_v21, %v1088_v23 }
 0x371   : > { %1875 = vtanh.f32 %v2561_v25 }
 0x37b   : > { %v1876_v31 = vpop.eup %1875 }
 0x37c   : > { %v1092_v32 = vmul.f32 %v1876_v31, %v1087_v26  ;;  %v1212_v26 = vunpack.c.h.bf16 %v1208_v45 }
 0x37e   : > { %v1093_v33 = vpack.c.bf16 %v1092_v32, %v1092_v32 }
 0x380   : > { %1134 = vmatmul.mubr.bf16.vlgmr.msra.gmra.mrb[8].mxu0 %v1093_v33  ;;  %1175 = vmatmul.mubr.bf16.vlgmr.msra.gmra.mrb[8].mxu1 %v1093_v33 }
 0x381   : > { %1214 = vmatpush1.bf16.msra.mxu0 %v2372_v55  ;;  %1255 = vmatpush1.bf16.msra.mxu1 %v2384_v60  ;;  %v1095_v55 = vld [vmem:[#allocation3 + $0x20] sm:$0xff] }
 0x382   : > { %1215 = vmatprep.subr.bf16.mxu0 %v2377_v57  ;;  %1256 = vmatprep.subr.bf16.mxu1 %v2390_v62  ;;  %v1097_v57 = vunpack.c.l.bf16 %v1095_v55 }
 0x383   : > { %1245 = vmatprep.mubr.bf16.mxu0 %v2116_v56  ;;  %1286 = vmatprep.mubr.bf16.mxu1 %v2116_v56  ;;  %v1096_v56 = vld [vmem:[#allocation3 + $0x28] sm:$0xff] }
 0x384   : > { %v1099_v60 = vunpack.c.l.bf16 %v1096_v56 }
 0x385   : > { %1216 = vmatpush1.bf16.msra.mxu0 %v2382_v59  ;;  %1257 = vmatpush1.bf16.msra.mxu1 %v2393_v63  ;;  %v1098_v59 = vunpack.c.h.bf16 %v1095_v55 }
 0x386   : > { %1217 = vmatprep.subr.bf16.mxu0 %v2387_v61  ;;  %1258 = vmatprep.subr.bf16.mxu1 %v2402_v2 }
 0x389   : > { %1218 = vmatpush1.bf16.msra.mxu0 %v2397_v0  ;;  %1259 = vmatpush1.bf16.msra.mxu1 %v2405_v3 }
 0x38a   : > { %1219 = vmatprep.subr.bf16.mxu0 %v2400_v1  ;;  %1260 = vmatprep.subr.bf16.mxu1 %v2411_v5 }
 0x38d   : > { %1220 = vmatpush1.bf16.msra.mxu0 %v2409_v4  ;;  %1261 = vmatpush1.bf16.msra.mxu1 %v2419_v8 }
 0x38e   : > { %1221 = vmatprep.subr.bf16.mxu0 %v2414_v6  ;;  %1262 = vmatprep.subr.bf16.mxu1 %v2423_v9 }
 0x391   : > { %1222 = vmatpush1.bf16.msra.mxu0 %v2417_v7  ;;  %1263 = vmatpush1.bf16.msra.mxu1 %v2429_v11  ;;  %v1100_v7 = vunpack.c.h.bf16 %v1096_v56 }
 0x392   : > { %1223 = vmatprep.subr.bf16.mxu0 %v2426_v10  ;;  %1264 = vmatprep.subr.bf16.mxu1 %v2435_v13 }
 0x395   : > { %1224 = vmatpush1.bf16.msra.mxu0 %v2433_v12  ;;  %1265 = vmatpush1.bf16.msra.mxu1 %v2441_v15 }
 0x396   : > { %1225 = vmatprep.subr.bf16.mxu0 %v2438_v14  ;;  %1266 = vmatprep.subr.bf16.mxu1 %v2447_v17 }
 0x399   : > { %1226 = vmatpush1.bf16.msra.mxu0 %v2445_v16  ;;  %1267 = vmatpush1.bf16.msra.mxu1 %v2453_v19 }
 0x39a   : > { %1227 = vmatprep.subr.bf16.mxu0 %v2450_v18  ;;  %1268 = vmatprep.subr.bf16.mxu1 %v2459_v22 }
 0x39d   : > { %1228 = vmatpush1.bf16.msra.mxu0 %v2457_v20  ;;  %1269 = vmatpush1.bf16.msra.mxu1 %v2463_v24 }
 0x453   : > { %v1135_v61 = vpop.f32.mrb[8].mxu0  ;;  %v1176_v62 = vpop.f32.mrb[8].mxu1 }
 0x454   : > { %v1136_v63 = vadd.f32 %v1135_v61, %v1097_v57  ;;  %v1137_v0 = vpop.f32.mrb[9].mxu0  ;;  %v1178_v1 = vpop.f32.mrb[9].mxu1  ;;  %v1177_v6 = vadd.f32 %v1176_v62, %v1099_v60 }
 0x455   : > { %v1138_v2 = vadd.f32 %v1137_v0, %v1098_v59  ;;  %v1139_v3 = vpop.f32.mrb[10].mxu0  ;;  %v1180_v4 = vpop.f32.mrb[10].mxu1  ;;  %v1179_v14 = vadd.f32 %v1178_v1, %v1100_v7 }
 0x456   : > { %v1183_v5 = vadd.f32 %v1136_v63, %v2507_v35  ;;  %v1140_v8 = vpop.f32.mrb[11].mxu0  ;;  %v1181_v9 = vpop.f32.mrb[11].mxu1  ;;  %v1185_v13 = vadd.f32 %v1177_v6, %v2511_v43 }
 0x457   : > { %v1184_v10 = vadd.f32 %v1138_v2, %v2509_v37  ;;  %v1186_v15 = vadd.f32 %v1179_v14, %v2516_v27  ;;  %v1901_v14 = vld [vmem:[#allocation14 + $0x20] sm:$0xff] (!%p1622_p13)  }
 0x458   : > { %v1187_v11 = vmul.f32 0.5, %v1183_v5 }
 0x459   : > { %v1191_v12 = vmul.f32 0.5, %v1184_v10  ;;  %v1196_v16 = vmul.f32 0.5, %v1186_v15  ;;  %v2117_v10 = vmov (!%p1622_p13), 0.0   ;;  %v1902_v15 = vld [vmem:[#allocation14 + $0x28] sm:$0xff] (!%p1622_p13)  }
 0x45a   : > { %1877 = vtanh.f32 %v1187_v11  ;;  %1649 = vmatprep.subr.bf16.mxu0 (!%p1622_p13), %v2117_v10  ;;  %v1898_v11 = vld [vmem:[#allocation14 + $0x8] sm:$0xff] (!%p1622_p13)  }
 0x45b   : > { %1879 = vtanh.f32 %v1191_v12  ;;  %v1899_v12 = vld [vmem:[#allocation14 + $0x10] sm:$0xff] (!%p1622_p13)  }
 0x45c   : > { %1881 = vtanh.f32 %v1185_v13  ;;  %v1900_v13 = vld [vmem:[#allocation14 + $0x18] sm:$0xff] (!%p1622_p13)  }
 0x45d   : > { %1883 = vtanh.f32 %v1196_v16  ;;  %v1903_v16 = vld [vmem:[#allocation14 + $0x30] sm:$0xff] (!%p1622_p13)  }
 0x464   : > { %v1878_v17 = vpop.eup %1877 }
 0x465   : > { %v1880_v18 = vpop.eup %1879  ;;  %v1189_v19 = vmul.f32 0.5, %v1878_v17  ;;  %v1904_v17 = vld [vmem:[#allocation14 + $0x38] sm:$0xff] (!%p1622_p13)  }
 0x466   : > { %v1193_v20 = vmul.f32 0.5, %v1880_v18  ;;  %v1882_v24 = vpop.eup %1881 }
 0x467   : > { %v1190_v22 = vadd.f32 0.5, %v1189_v19  ;;  %v1884_v54 = vpop.eup %1883  ;;  %v1623_v19 = vld [vmem:[%s2652_s6] ss:$0 sm:$0xff] (!%p1622_p13) }
 0x468   : > { %v1194_v44 = vadd.f32 0.5, %v1193_v20  ;;  %v1198_v39 = vmul.f32 0.5, %v1884_v54 }
 0x469   : > { %v1201_v34 = vmul.f32 %v1882_v24, %v1190_v22 }
 0x46a   : > { %v1200_v36 = vmul.f32 %v1194_v44, %v2561_v25  ;;  %v1199_v58 = vadd.f32 0.5, %v1198_v39 }
 0x46c   : > { %v1202_v38 = vadd.f32 %v1201_v34, %v1200_v36 }
 0x46e   : > { %1885 = vtanh.f32 %v1202_v38 }
 0x478   : > { %v1886_v40 = vpop.eup %1885 }
 0x479   : > { %v1204_v41 = vmul.f32 %v1886_v40, %v1199_v58 }
 0x47b   : > { %v1205_v42 = vpack.c.bf16 %v1204_v41, %v1204_v41 }
 0x47d   : > { %1246 = vmatmul.mubr.bf16.vlgmr.msra.gmra.mrb[12].mxu0 %v1205_v42  ;;  %1287 = vmatmul.mubr.bf16.vlgmr.msra.gmra.mrb[12].mxu1 %v1205_v42 }
 0x47e   : > { %1665 = vmatprep.mubr.msk.bf16.mxu0 (!%p1622_p13), %vm2118_vm0, %v2117_v10 }
 0x550   : > { %v1247_v49 = vpop.f32.mrb[12].mxu0  ;;  %v1288_v50 = vpop.f32.mrb[12].mxu1 }
 0x551   : > { %v1248_v51 = vadd.f32 %v1247_v49, %v1209_v46  ;;  %v1249_v52 = vpop.f32.mrb[13].mxu0  ;;  %v1290_v53 = vpop.f32.mrb[13].mxu1  ;;  %v1289_v30 = vadd.f32 %v1288_v50, %v1211_v48 }
 0x552   : > { %v1250_v21 = vadd.f32 %v1249_v52, %v1210_v47  ;;  %v1251_v23 = vpop.f32.mrb[14].mxu0  ;;  %v1292_v25 = vpop.f32.mrb[14].mxu1  ;;  %v1291_v59 = vadd.f32 %v1290_v53, %v1212_v26 }
 0x553   : > { %v1295_v28 = vadd.f32 %v1248_v51, %v2507_v35  ;;  %v1252_v31 = vpop.f32.mrb[15].mxu0  ;;  %v1293_v32 = vpop.f32.mrb[15].mxu1  ;;  %v1297_v57 = vadd.f32 %v1289_v30, %v2511_v43 }
 0x554   : > { %v1296_v33 = vadd.f32 %v1250_v21, %v2509_v37  ;;  %v1298_v60 = vadd.f32 %v1291_v59, %v2516_v27  ;;  %v1897_v27 = vld [vmem:[#allocation14] sm:$0xff] (!%p1622_p13)  }
 0x555   : > { %v1299_v55 = vmul.f32 0.5, %v1295_v28  ;;  %1650 = vmatpush3.bf16.msra.mxu0 (!%p1622_p13), %v1897_v27 }
 0x556   : > { %v1303_v56 = vmul.f32 0.5, %v1296_v33  ;;  %v1308_v61 = vmul.f32 0.5, %v1298_v60  ;;  %1651 = vmatprep.subr.bf16.mxu0 (!%p1622_p13), %v2117_v10 }
 0x557   : > { %1887 = vtanh.f32 %v1299_v55 }
 0x558   : > { %1889 = vtanh.f32 %v1303_v56 }
 0x559   : > { %1891 = vtanh.f32 %v1297_v57  ;;  %1652 = vmatpush3.bf16.msra.mxu0 (!%p1622_p13), %v1898_v11 }
 0x55a   : > { %1893 = vtanh.f32 %v1308_v61  ;;  %1653 = vmatprep.subr.bf16.mxu0 (!%p1622_p13), %v2117_v10 }
 0x55d   : > { %1654 = vmatpush3.bf16.msra.mxu0 (!%p1622_p13), %v1899_v12 }
 0x55e   : > { %1655 = vmatprep.subr.bf16.mxu0 (!%p1622_p13), %v2117_v10 }
 0x561   : > { %v1888_v62 = vpop.eup %1887  ;;  %1656 = vmatpush3.bf16.msra.mxu0 (!%p1622_p13), %v1900_v13 }
 0x562   : > { %v1890_v63 = vpop.eup %1889  ;;  %v1301_v35 = vmul.f32 0.5, %v1888_v62  ;;  %1657 = vmatprep.subr.bf16.mxu0 (!%p1622_p13), %v2117_v10 }
 0x563   : > { %v1305_v0 = vmul.f32 0.5, %v1890_v63  ;;  %v1892_v2 = vpop.eup %1891 }
 0x564   : > { %v1302_v1 = vadd.f32 0.5, %v1301_v35  ;;  %v1894_v43 = vpop.eup %1893 }
 0x565   : > { %v1306_v3 = vadd.f32 0.5, %v1305_v0  ;;  %v1310_v6 = vmul.f32 0.5, %v1894_v43  ;;  %1658 = vmatpush3.bf16.msra.mxu0 (!%p1622_p13), %v1901_v14 }
 0x566   : > { %v1313_v37 = vmul.f32 %v1892_v2, %v1302_v1  ;;  %1659 = vmatprep.subr.bf16.mxu0 (!%p1622_p13), %v2117_v10 }
 0x567   : > { %v1312_v4 = vmul.f32 %v1306_v3, %v1202_v38  ;;  %v1311_v7 = vadd.f32 0.5, %v1310_v6 }
 0x569   : > { %v1314_v5 = vadd.f32 %v1313_v37, %v1312_v4  ;;  %1660 = vmatpush3.bf16.msra.mxu0 (!%p1622_p13), %v1902_v15 }
 0x56a   : > { %1661 = vmatprep.subr.bf16.mxu0 (!%p1622_p13), %v2117_v10 }
 0x56b   : > { %1895 = vtanh.f32 %v1314_v5  ;;  %1318 = vst [vmem:[#allocation5] sm:$0xff] %v1314_v5 }
 0x56d   : > { %1662 = vmatpush3.bf16.msra.mxu0 (!%p1622_p13), %v1903_v16 }
 0x56e   : > { %1663 = vmatprep.subr.bf16.mxu0 (!%p1622_p13), %v2117_v10 }
 0x571   : > { %1664 = vmatpush3.bf16.msra.mxu0 (!%p1622_p13), %v1904_v17 }
 0x572   : > { %1322 = sbr.rel (%p1622_p13) target bundleno = 1617 (0x651), region = 75 }
 0x575   : > { %v1896_v8 = vpop.eup %1895 }
 0x576   : > { %v1316_v9 = vmul.f32 %v1896_v8, %v1311_v7 }
 0x578   : > { %1317 = vst [vmem:[#allocation4] sm:$0xff] %v1316_v9  ;;  %v1323_v18 = vpack.c.bf16 (!%p1622_p13), %v1316_v9, %v1316_v9 }
 0x57a   : > { %1666 = vmatmul.mubr.bf16.vlgmr.msra.gmra.mrb[0].mxu0 %v1323_v18 }
 0x64d   : > { %v1429_v20 = vpop.f32.mrb[0].mxu0 }
 0x64e   : > { %v1430_v22 = vadd.f32 %v1623_v19, %v1429_v20  ;;  %v1667_v24 = vpop.f32.mrb[1].mxu0 }
 0x64f   : > { %v1432_v44 = vpop.f32.mrb[2].mxu0 }
 0x650   : > { %1435 = vst [vmem:[#allocation16] sm:$0xff] %v1430_v22  ;;  %v1668_v34 = vpop.f32.mrb[3].mxu0 }
 0x651 PF: > { %s2669_s25 = sadd.s32 4294967295, %s2097_s13   ;;  %s2119_s29 = smov [#allocation16]  }
 0x652   : > { %p2611_p0 = scmp.eq.s32.totalorder %s2669_s25, 1  ;;  %s1445_s30 = sshll.u32 %s2119_s29, 4  ;;  %s1446_s30 = int_to_ptr.vmem [resolvable:$true] %s1445_s30 }
 0x653   : > { %s2027_s24 = scalar_lea.vmem %s1446_s30, 128  ;;  %p2034_p3 = scmp.lt.s32.totalorder %s1446_s30, %s1446_s30 }
 0x654   : > { %p2028_p1 = scmp.ne.s32.totalorder %s1446_s30, %s2027_s24  ;;  %p2035_p4 = scmp.lt.s32.totalorder %s2027_s24, %s2027_s24 }
 0x656   : > { %p2029_p2 = pnand %p2028_p1, %p2611_p0  ;;  %p2036_p7 = por %p2035_p4, %p2034_p3 }
 0x658   : > { %p2030_p9 = pneg %p2029_p2 }
 0x65a   : > { %p2037_p10 = pnand %p2036_p7, %p2030_p9 }
 0x65c   : > { %2040 = shalt.err (!%p2037_p10)
}
 0x65d   : > { %s2041_s15 = scalar_lea.hbm %s2653_s7, 128 }
 0x65e   : > { %p2042_p12 = scmp.ne.s32.totalorder %s2653_s7, %s2041_s15  ;;  %p2047_p8 = scmp.lt.u32.totalorder %s2041_s15, %s2653_s7 }
 0x660   : > { %p2043_p6 = pnand %p2042_p12, %p2611_p0 }
 0x662   : > { %p2044_p5 = pneg %p2043_p6 }
 0x664   : > { %p2049_p11 = pnand %p2047_p8, %p2044_p5 }
 0x666   : > { %2052 = shalt.err (!%p2049_p11)
}
 0x667   : > { %1686 = dma.vmem_to_hbm [thread:$0]  (%p2611_p0), %s1446_s30, 128, %s2653_s7, [#allocation10]  }
 0x668   : > { %2084 = dma.done.wait (%p2611_p0), [#allocation10], 128  }
 0x669   : > { %2086 = vsyncadd (%p2611_p0), [#allocation10], 4294967168 }
 0x66a PF: > { %s25_s13 = sadd.s32 1, %s2097_s13   ;;  %s2671_s11 = smov %s2093_s12 }
 0x66b   : > { %p22_p13 = scmp.ge.s32.totalorder %s25_s13, 4   ;;  %s2672_s12 = smov %s2674_s19 }
 0x66d   :  { %24 = sbr.rel (!%p22_p13) target bundleno = 17 (0x11), region = 124 }
 0x674   :  { %1458 = vsyncpa [#allocation9], 1 }
 0x675   :  { %1460 = vsyncpa [#allocation9 + $0x1], 1 }
 0x676   :  { %1461 = vsyncpa [#allocation12], 1 }
 0x677   :  { %1462 = vsyncpa [#allocation15], 1 }
 0x678   :  { %1463 = vsyncpa [#allocation10], 1 }
 0x679   :  { %1465 = vsyncpa [#allocation10 + $0x1], 1 }

</bundles_post_ra>
